<compile_context>
chip_gen: v7x
topology: tpu7x:2x2x1
jax: 0.10.0
libtpu: 0.0.40
codegen_flags: <defaults>
</compile_context>

<pallas_src>
import numpy as np
import jax
import jax.numpy as jnp
from jax.experimental import pallas as pl
from jax.experimental.pallas import tpu as pltpu

VMEM = pltpu.MemorySpace.VMEM

HIDDEN = 32
NUM_NODE_FEATURES = 8
NUM_EDGE_FEATURES = 4
DEPTH = 3
BN_EPS = 1e-5

# ConcatTetraPermuter permutation table (same as the PyTorch module)
TETRA_PERMS = np.array(
    [[0, 1, 2, 3], [0, 2, 3, 1], [0, 3, 1, 2], [1, 0, 3, 2], [1, 2, 0, 3],
     [1, 3, 2, 0], [2, 0, 1, 3], [2, 1, 3, 0], [2, 3, 0, 1], [3, 0, 2, 1],
     [3, 1, 0, 2], [3, 2, 1, 0]], dtype=np.int32)


def _round_up(v, m):
    return ((v + m - 1) // m) * m


# ------------------------------ slab packing ----------------------------------

def pack_slab(items, width):
    """Pack (name, 2-D array) pairs into one (rows, width) f32 slab.

    Each item is padded to a multiple of 8 rows so every in-kernel slice is
    sublane-aligned.  Returns (slab, {name: (row_offset, rows, cols)}).
    """
    offsets, chunks, off = {}, [], 0
    for name, a in items:
        a = np.asarray(a, np.float32)
        r, c = a.shape
        assert c <= width, (name, a.shape, width)
        rp = _round_up(r, 8)
        buf = np.zeros((rp, width), np.float32)
        buf[:r, :c] = a
        offsets[name] = (off, r, c)
        chunks.append(buf)
        off += rp
    return np.concatenate(chunks, axis=0), offsets


# --------------------------- parameter construction --------------------------

def _init_linear(key, fan_in, fan_out):
    kw, kb = jax.random.split(key)
    w = jax.random.normal(kw, (fan_in, fan_out), jnp.float32) / np.sqrt(fan_in)
    b = jax.random.normal(kb, (1, fan_out), jnp.float32) * 0.01
    return w, b


def _init_bn(hidden):
    # PyTorch BatchNorm1d defaults: weight=1, bias=0, running_mean=0, running_var=1
    return dict(gamma=jnp.ones((1, hidden), jnp.float32),
                beta=jnp.zeros((1, hidden), jnp.float32),
                mean=jnp.zeros((1, hidden), jnp.float32),
                var=jnp.ones((1, hidden), jnp.float32))


def _init_tetra(key, hidden):
    k1, k2, k3 = jax.random.split(key, 3)
    wbs, bbs = _init_linear(k1, hidden * 4, hidden)     # W_bs: Linear(4H, H)
    w1, b1 = _init_linear(k2, hidden, hidden)           # mlp_out[0]
    w2, b2 = _init_linear(k3, hidden, hidden)           # mlp_out[3]
    return dict(wbs=wbs, bbs=bbs, w1=w1, b1=b1, bn=_init_bn(hidden), w2=w2, b2=b2)


def _init_conv(key, hidden):
    k1, k2, k3 = jax.random.split(key, 3)
    lin_w, lin_b = _init_linear(k1, hidden, hidden)
    mlp_w, mlp_b = _init_linear(k2, hidden, hidden)
    return dict(lin_w=lin_w, lin_b=lin_b, mlp_w=mlp_w, mlp_b=mlp_b,
                mlp_bn=_init_bn(hidden), tetra=_init_tetra(k3, hidden))


def init_params(key):
    keys = jax.random.split(key, DEPTH + 3)
    ei_w, ei_b = _init_linear(keys[0], NUM_NODE_FEATURES + NUM_EDGE_FEATURES, HIDDEN)
    convs = [_init_conv(keys[1 + l], HIDDEN) for l in range(DEPTH)]
    edge_to_node = _init_conv(keys[DEPTH + 1], HIDDEN)
    ffn_w, ffn_b = _init_linear(keys[DEPTH + 2], HIDDEN, 1)
    return dict(edge_init_w=ei_w, edge_init_b=ei_b, convs=convs,
                edge_to_node=edge_to_node, ffn_w=ffn_w, ffn_b=ffn_b)


def _fold_bn(w, b, bn):
    # Linear -> BatchNorm1d(eval) folded:  W' = W*scale, b' = b*scale + shift
    scale = bn['gamma'] / jnp.sqrt(bn['var'] + BN_EPS)      # (1, H)
    shift = bn['beta'] - bn['mean'] * scale
    return w * scale, b * scale + shift


def pack_weight_slab(params):
    """Fold BN + 1/3, split the edge_init concat, pack everything into one slab."""
    layers = params['convs'] + [params['edge_to_node']]     # L = DEPTH + 1
    items = [
        ('w_node', params['edge_init_w'][:NUM_NODE_FEATURES]),
        ('w_edge', params['edge_init_w'][NUM_NODE_FEATURES:]),
        ('b_init', params['edge_init_b']),
    ]
    for l, c in enumerate(layers):
        t = c['tetra']
        w1f, b1f = _fold_bn(t['w1'], t['b1'], t['bn'])
        items += [
            (f'lin_w{l}', c['lin_w']), (f'lin_b{l}', c['lin_b']),
            (f'wbs{l}', t['wbs']),     (f'bbs{l}', t['bbs']),     # (4H, H)
            (f'w1_{l}', w1f / 3.0),    (f'b1_{l}', b1f),          # 1/3 folded here
            (f'w2_{l}', t['w2']),      (f'b2_{l}', t['b2']),
        ]
    for l, c in enumerate(params['convs']):
        wf, bf = _fold_bn(c['mlp_w'], c['mlp_b'], c['mlp_bn'])
        items += [(f'mlp_w{l}', wf), (f'mlp_b{l}', bf)]
    items += [('ffn_w', params['ffn_w']), ('ffn_b', params['ffn_b'])]
    return pack_slab(items, width=HIDDEN)


# --------------------------- graph index preprocessing ------------------------
# TODO(synk): the data-dependent index discovery (torch.nonzero / torch.where over
# edge_index) needs static shapes, so it runs host-side with NumPy and is baked
# into one-hot selection matrices applied on the MXU inside the fused kernel.

def build_graph_constants(row, col, parity, batch):
    E, N = len(row), len(parity)
    assert E % 2 == 0                      # module assumes paired directed edges
    N_pad = _round_up(N, 8)
    B = int(batch.max()) + 1
    B_pad = _round_up(B, 8)

    # Internal edge ordering: forward pair-members first, then their reverses,
    # so the reverse of internal edge i is internal edge (i + E/2) % E and
    # rev_message becomes a sublane half-rotation inside the kernel.
    perm = np.concatenate([np.arange(0, E, 2), np.arange(1, E, 2)])
    inv = np.empty(E, np.int64)
    inv[perm] = np.arange(E)
    row_i, col_i = row[perm], col[perm]

    row_sel = np.zeros((E, N_pad), np.float32)
    row_sel[np.arange(E), row_i] = 1.0                      # x[row] / a_message[row]
    scatter = np.zeros((N_pad, E), np.float32)
    scatter[col_i, np.arange(E)] = 1.0                      # aggr='add' over targets

    # Tetra neighbour / attr-edge discovery in the ORIGINAL ordering (module
    # semantics), then mapped to internal edge positions.  Every chiral center
    # must have exactly 4 in-edges (same assumption as the PyTorch module).
    tetra_ids = np.nonzero(parity)[0]
    T = len(tetra_ids)
    tetra_nei = np.stack([row[col == i] for i in tetra_ids]).astype(np.int64)
    ccw = parity[tetra_ids] == -1
    tetra_nei[ccw] = tetra_nei[ccw][:, [1, 0, 2, 3]]
    attr_ids = np.zeros((T, 4), np.int64)
    for t in range(T):
        for k in range(4):
            src, dst = tetra_nei[t, k], tetra_ids[t]
            attr_ids[t, k] = int(np.nonzero((row == src) & (col == dst))[0][0])
    attr_ids = inv[attr_ids]                                # -> internal edge index

    TP = 12 * T
    TP_pad = _round_up(TP, 8)
    T_pad = _round_up(T, 8)
    # Single concatenated gather matrix: rows [k*TP_pad + t*12 + p] select edge
    # attr_ids[t, TETRA_PERMS[p, k]]; the kernel re-tiles the 4 chunks into lanes
    # to form xp = edge_reps[:, TETRA_PERMS, :].flatten(2) of width 4H = 128.
    perm_sel = np.zeros((4 * TP_pad, E), np.float32)
    for t in range(T):
        for p in range(12):
            for k in range(4):
                perm_sel[k * TP_pad + t * 12 + p, attr_ids[t, TETRA_PERMS[p, k]]] = 1.0
    ssum = np.zeros((T_pad, TP_pad), np.float32)
    for t in range(T):
        ssum[t, t * 12:(t + 1) * 12] = 1.0                  # 1/3 folded into w1

    tet_scatter = np.zeros((N_pad, T_pad), np.float32)
    tet_scatter[tetra_ids, np.arange(T)] = 1.0
    notmask = np.ones((N_pad, 1), np.float32)               # precomputed (1 - mask)
    notmask[tetra_ids] = 0.0

    pool = np.zeros((B_pad, N_pad), np.float32)
    for b in range(B):
        m = batch == b
        pool[b, np.nonzero(m)[0]] = 1.0 / m.sum()           # global_mean_pool

    items = [('row_sel', row_sel), ('scatter', scatter), ('perm_sel', perm_sel),
             ('tet_scatter', tet_scatter), ('notmask', notmask),
             ('pool', pool), ('ssum', ssum)]
    c_width = _round_up(max(a.shape[1] for _, a in items), 128)
    c_slab, c_off = pack_slab(items, c_width)

    return dict(N=N, N_pad=N_pad, B=B, B_pad=B_pad, E=E,
                TP_pad=TP_pad, T_pad=T_pad, perm=perm,
                c_slab=c_slab, c_off=c_off)


# ------------------------------- fused forward --------------------------------

def make_forward(w_slab, w_off, g):
    c_off = g['c_off']
    E, TP_pad, B_pad = g['E'], g['TP_pad'], g['B_pad']
    E_half = E // 2

    def kernel(x_ref, e_ref, c_ref, w_ref, out_ref):
        """Whole TetraDMPNN forward; 4 VMEM operands, all weights/constants
        sliced at static offsets from the two packed slabs."""
        def dot(a, b):
            return jnp.dot(a, b, preferred_element_type=jnp.float32)

        def C(name):
            o, r, c = c_off[name]
            return c_ref[pl.ds(o, r), pl.ds(0, c)]

        def W(name):
            o, r, c = w_off[name]
            return w_ref[pl.ds(o, r), pl.ds(0, c)]

        row_sel, scatter = C('row_sel'), C('scatter')
        perm_sel, tet_scatter = C('perm_sel'), C('tet_scatter')
        notmask, pool, ssum = C('notmask'), C('pool'), C('ssum')

        # edge_init: relu(Linear(cat([x[row], edge_attr]))) — concat folded into
        # split weights (x[row] @ W_node + edge_attr @ W_edge + b).
        x_row = dot(row_sel, x_ref[...])                               # (E, Fn)
        edge_attr = jnp.maximum(
            dot(x_row, W('w_node')) + dot(e_ref[...], W('w_edge')) + W('b_init'),
            0.0)                                                       # (E, H)

        def dmpnn_conv(l, e_attr):
            # DMPNNConv.message = relu(lin(edge_attr)); aggr='add' over targets.
            msg = jnp.maximum(dot(e_attr, W(f'lin_w{l}')) + W(f'lin_b{l}'), 0.0)
            a = dot(scatter, msg)                                      # (Np, H)
            # ConcatTetraPermuter collapsed to 2 matmuls: one gather of all 4
            # permuted neighbour chunks, one K = 4H = 128 W_bs contraction.
            g4 = dot(perm_sel, e_attr)                                 # (4*TPp, H)
            xp = jnp.concatenate(
                [g4[k * TP_pad:(k + 1) * TP_pad] for k in range(4)], axis=1)
            nei = jnp.maximum(dot(xp, W(f'wbs{l}')) + W(f'bbs{l}'), 0.0)
            s = dot(ssum, nei)                                         # (Tp, H)
            # mlp_out: Linear -> BN(eval, folded; 1/3 folded too) -> ReLU -> Linear
            y1 = jnp.maximum(dot(s, W(f'w1_{l}')) + W(f'b1_{l}'), 0.0)
            tet = dot(y1, W(f'w2_{l}')) + W(f'b2_{l}')                 # (Tp, H)
            # a_message[tetra_ids] = tetra_update(...)
            return a * notmask + dot(tet_scatter, tet)

        for l in range(DEPTH):
            a = dmpnn_conv(l, edge_attr)
            a_row = dot(row_sel, a)                                    # (E, H)
            # Reverse-edge pairing: internal ordering places the reverse of edge
            # i at i + E/2, so rev_message is a half-rotation along sublanes
            # (two static slices + concat; no E x E matmul, no MXU use).
            rev = jnp.concatenate([edge_attr[E_half:], edge_attr[:E_half]], axis=0)
            # conv MLP: Linear -> BatchNorm1d(eval, folded) -> ReLU
            y = jnp.maximum(dot(a_row - rev, W(f'mlp_w{l}')) + W(f'mlp_b{l}'), 0.0)
            # Eval-mode residual: h = dropout([relu](h_e)) + h_e == 2 * h_e.
            edge_attr = 2.0 * y

        a = dmpnn_conv(DEPTH, edge_attr)           # edge_to_node (edge half unused)
        t = dot(a, W('ffn_w'))                     # ffn applied before the pool
        out_ref[...] = dot(pool, t) + W('ffn_b')   # global_mean_pool + bias

    call = pl.pallas_call(
        kernel,
        out_shape=jax.ShapeDtypeStruct((B_pad, 1), jnp.float32),
        in_specs=[pl.BlockSpec(memory_space=VMEM)] * 4,
        out_specs=pl.BlockSpec(memory_space=VMEM),
    )
    c_dev = jnp.asarray(g['c_slab'])
    w_dev = jnp.asarray(w_slab)

    @jax.jit
    def forward(x_padded, edge_attr_internal):
        # x pre-padded to N_pad and edge_attr pre-permuted to the internal edge
        # ordering, so this jit is a single pallas_call dispatch.
        return call(x_padded, edge_attr_internal, c_dev, w_dev)

    return forward


# ------------------------- float64 NumPy reference (eval) ----------------------

def reference_forward(params, row, col, parity, batch, x, eraw):
    f64 = lambda a: np.asarray(a, np.float64)
    relu = lambda v: np.maximum(v, 0.0)

    def bn_eval(v, bn):
        return ((v - f64(bn['mean'])) / np.sqrt(f64(bn['var']) + BN_EPS)
                * f64(bn['gamma']) + f64(bn['beta']))

    N, E, H = len(parity), len(row), HIDDEN
    tetra_ids = np.nonzero(parity)[0]
    T = len(tetra_ids)
    tetra_nei = np.stack([row[col == i] for i in tetra_ids]).astype(np.int64)
    ccw = parity[tetra_ids] == -1
    tetra_nei[ccw] = tetra_nei[ccw][:, [1, 0, 2, 3]]
    attr_ids = np.zeros((T, 4), np.int64)
    for t in range(T):
        for k in range(4):
            src, dst = tetra_nei[t, k], tetra_ids[t]
            attr_ids[t, k] = int(np.nonzero((row == src) & (col == dst))[0][0])
    rev_idx = np.arange(E) ^ 1

    def conv(cp, e_attr, compute_edge=True):
        msg = relu(e_attr @ f64(cp['lin_w']) + f64(cp['lin_b']))
        a = np.zeros((N, H))
        np.add.at(a, col, msg)
        tp = cp['tetra']
        edge_reps = e_attr[attr_ids.reshape(-1)].reshape(T, 4, H)
        xp = edge_reps[:, TETRA_PERMS, :].reshape(T, 12, 4 * H)
        nei = relu(xp @ f64(tp['wbs']) + f64(tp['bbs']))
        s = nei.sum(axis=1) / 3.0
        y1 = relu(bn_eval(s @ f64(tp['w1']) + f64(tp['b1']), tp['bn']))
        a[tetra_ids] = y1 @ f64(tp['w2']) + f64(tp['b2'])
        if not compute_edge:
            return a, None
        rev = e_attr[rev_idx]
        h = relu(bn_eval((a[row] - rev) @ f64(cp['mlp_w']) + f64(cp['mlp_b']),
                         cp['mlp_bn']))
        return a, h

    e0 = np.concatenate([f64(x)[row], f64(eraw)], axis=1)
    h = relu(e0 @ f64(params['edge_init_w']) + f64(params['edge_init_b']))
    for l in range(DEPTH):
        _, eh = conv(params['convs'][l], h)
        h = eh + eh                      # eval: dropout identity, relu no-op
    a, _ = conv(params['edge_to_node'], h, compute_edge=False)
    B = int(batch.max()) + 1
    gp = np.zeros((B, H))
    for b in range(B):
        m = batch == b
        gp[b] = a[m].mean(axis=0)
    out = gp @ f64(params['ffn_w']) + f64(params['ffn_b'])
    return out[:, 0]


# ----------------------------------- main --------------------------------------

if __name__ == "__main__":
    # Two disjoint "molecules"; each has one tetrahedral (chiral) center of degree 4.
    und_edges = [(0, 1), (0, 2), (0, 3), (0, 4), (5, 6), (5, 7), (5, 8), (5, 9)]
    row_l, col_l = [], []
    for (u, v) in und_edges:             # paired directed edges (u->v, v->u)
        row_l += [u, v]
        col_l += [v, u]
    row = np.array(row_l, np.int64)
    col = np.array(col_l, np.int64)
    N = 10
    parity = np.zeros(N, np.int64)
    parity[0] = 1        # CW chiral center
    parity[5] = -1       # CCW chiral center
    batch = np.array([0] * 5 + [1] * 5, np.int64)

    g = build_graph_constants(row, col, parity, batch)

    key = jax.random.PRNGKey(0)
    kx, ke, kp = jax.random.split(key, 3)
    x = jax.random.normal(kx, (N, NUM_NODE_FEATURES), jnp.float32)
    edge_attr = jax.random.normal(ke, (len(row), NUM_EDGE_FEATURES), jnp.float32)
    params = init_params(kp)
    w_slab, w_off = pack_weight_slab(params)

    fwd = make_forward(w_slab, w_off, g)

    # Host-side input prep: pre-pad nodes to the sublane multiple and re-order
    # edges to the internal (forward-block / reverse-block) layout once.
    x_p = jnp.pad(x, ((0, g['N_pad'] - N), (0, 0)))
    eraw_int = jnp.asarray(np.asarray(edge_attr)[g['perm']])

    out_pad = jax.block_until_ready(fwd(x_p, eraw_int))
    out = np.asarray(out_pad)[:g['B'], 0]                   # .squeeze(-1)
    assert out.shape == (2,) and np.all(np.isfinite(out))

    # correctness check vs a float64 NumPy mirror of the PyTorch forward
    ref = reference_forward(params, row, col, parity, batch,
                            np.asarray(x), np.asarray(edge_attr))
    err = float(np.max(np.abs(out.astype(np.float64) - ref)))
    scale = float(np.max(np.abs(ref))) + 1e-6
    assert err / scale < 5e-2, (err, scale, out, ref)
    print("KERNEL_OK")
</pallas_src>

<mosaic_0001>
module attributes {stable_mosaic.version = 11 : i64} {
  func.func @kernel(%arg0: memref<16x8xf32, #tpu.memory_space<vmem>>, %arg1: memref<16x4xf32, #tpu.memory_space<vmem>>, %arg2: memref<176x128xf32, #tpu.memory_space<vmem>>, %arg3: memref<1208x32xf32, #tpu.memory_space<vmem>>, %arg4: memref<8x1xf32, #tpu.memory_space<vmem>>) attributes {dimension_semantics = [], scalar_prefetch = 0 : i64, scratch_operands = 0 : i64, tpu.core_type = #tpu.core_type<tc>} {
    %c0 = arith.constant 0 : index
    %c0_0 = arith.constant 0 : index
    %0 = vector.load %arg2[%c0, %c0_0] : memref<176x128xf32, #tpu.memory_space<vmem>>, vector<16x16xf32>
    %c16 = arith.constant 16 : index
    %c0_1 = arith.constant 0 : index
    %1 = vector.load %arg2[%c16, %c0_1] : memref<176x128xf32, #tpu.memory_space<vmem>>, vector<16x16xf32>
    %c32 = arith.constant 32 : index
    %c0_2 = arith.constant 0 : index
    %2 = vector.load %arg2[%c32, %c0_2] : memref<176x128xf32, #tpu.memory_space<vmem>>, vector<96x16xf32>
    %c128 = arith.constant 128 : index
    %c0_3 = arith.constant 0 : index
    %3 = vector.load %arg2[%c128, %c0_3] : memref<176x128xf32, #tpu.memory_space<vmem>>, vector<16x8xf32>
    %c144 = arith.constant 144 : index
    %c0_4 = arith.constant 0 : index
    %4 = vector.load %arg2[%c144, %c0_4] : memref<176x128xf32, #tpu.memory_space<vmem>>, vector<16x1xf32>
    %c160 = arith.constant 160 : index
    %c0_5 = arith.constant 0 : index
    %5 = vector.load %arg2[%c160, %c0_5] : memref<176x128xf32, #tpu.memory_space<vmem>>, vector<8x16xf32>
    %c168 = arith.constant 168 : index
    %c0_6 = arith.constant 0 : index
    %6 = vector.load %arg2[%c168, %c0_6] : memref<176x128xf32, #tpu.memory_space<vmem>>, vector<8x24xf32>
    %c0_7 = arith.constant 0 : index
    %c0_8 = arith.constant 0 : index
    %7 = vector.load %arg0[%c0_7, %c0_8] : memref<16x8xf32, #tpu.memory_space<vmem>>, vector<16x8xf32>
    %cst = arith.constant dense<0.000000e+00> : vector<16x8xf32>
    %8 = tpu.matmul %0, %7, %cst {dimension_numbers = #tpu.dot_dimension_numbers<[1], [0], [0], [1], [0, 0, 1, 1], [], []>} : vector<16x16xf32>, vector<16x8xf32>, vector<16x8xf32> -> vector<16x8xf32>
    %c0_9 = arith.constant 0 : index
    %c0_10 = arith.constant 0 : index
    %9 = vector.load %arg3[%c0_9, %c0_10] : memref<1208x32xf32, #tpu.memory_space<vmem>>, vector<8x32xf32>
    %cst_11 = arith.constant dense<0.000000e+00> : vector<16x32xf32>
    %10 = tpu.matmul %8, %9, %cst_11 {dimension_numbers = #tpu.dot_dimension_numbers<[1], [0], [0], [1], [0, 0, 1, 1], [], []>} : vector<16x8xf32>, vector<8x32xf32>, vector<16x32xf32> -> vector<16x32xf32>
    %c0_12 = arith.constant 0 : index
    %c0_13 = arith.constant 0 : index
    %11 = vector.load %arg1[%c0_12, %c0_13] : memref<16x4xf32, #tpu.memory_space<vmem>>, vector<16x4xf32>
    %c8 = arith.constant 8 : index
    %c0_14 = arith.constant 0 : index
    %12 = vector.load %arg3[%c8, %c0_14] : memref<1208x32xf32, #tpu.memory_space<vmem>>, vector<4x32xf32>
    %cst_15 = arith.constant dense<0.000000e+00> : vector<16x32xf32>
    %13 = tpu.matmul %11, %12, %cst_15 {dimension_numbers = #tpu.dot_dimension_numbers<[1], [0], [0], [1], [0, 0, 1, 1], [], []>} : vector<16x4xf32>, vector<4x32xf32>, vector<16x32xf32> -> vector<16x32xf32>
    %14 = arith.addf %10, %13 : vector<16x32xf32>
    %c16_16 = arith.constant 16 : index
    %c0_17 = arith.constant 0 : index
    %15 = vector.load %arg3[%c16_16, %c0_17] : memref<1208x32xf32, #tpu.memory_space<vmem>>, vector<1x32xf32>
    %16 = vector.broadcast %15 : vector<1x32xf32> to vector<16x32xf32>
    %17 = arith.addf %14, %16 : vector<16x32xf32>
    %cst_18 = arith.constant 0.000000e+00 : f32
    %18 = vector.broadcast %cst_18 : f32 to vector<16x32xf32>
    %19 = arith.maximumf %17, %18 : vector<16x32xf32>
    %c24 = arith.constant 24 : index
    %c0_19 = arith.constant 0 : index
    %20 = vector.load %arg3[%c24, %c0_19] : memref<1208x32xf32, #tpu.memory_space<vmem>>, vector<32x32xf32>
    %cst_20 = arith.constant dense<0.000000e+00> : vector<16x32xf32>
    %21 = tpu.matmul %19, %20, %cst_20 {dimension_numbers = #tpu.dot_dimension_numbers<[1], [0], [0], [1], [0, 0, 1, 1], [], []>} : vector<16x32xf32>, vector<32x32xf32>, vector<16x32xf32> -> vector<16x32xf32>
    %c56 = arith.constant 56 : index
    %c0_21 = arith.constant 0 : index
    %22 = vector.load %arg3[%c56, %c0_21] : memref<1208x32xf32, #tpu.memory_space<vmem>>, vector<1x32xf32>
    %23 = vector.broadcast %22 : vector<1x32xf32> to vector<16x32xf32>
    %24 = arith.addf %21, %23 : vector<16x32xf32>
    %cst_22 = arith.constant 0.000000e+00 : f32
    %25 = vector.broadcast %cst_22 : f32 to vector<16x32xf32>
    %26 = arith.maximumf %24, %25 : vector<16x32xf32>
    %cst_23 = arith.constant dense<0.000000e+00> : vector<16x32xf32>
    %27 = tpu.matmul %1, %26, %cst_23 {dimension_numbers = #tpu.dot_dimension_numbers<[1], [0], [0], [1], [0, 0, 1, 1], [], []>} : vector<16x16xf32>, vector<16x32xf32>, vector<16x32xf32> -> vector<16x32xf32>
    %cst_24 = arith.constant dense<0.000000e+00> : vector<96x32xf32>
    %28 = tpu.matmul %2, %19, %cst_24 {dimension_numbers = #tpu.dot_dimension_numbers<[1], [0], [0], [1], [0, 0, 1, 1], [], []>} : vector<96x16xf32>, vector<16x32xf32>, vector<96x32xf32> -> vector<96x32xf32>
    %29 = vector.extract_strided_slice %28 {offsets = [0, 0], sizes = [24, 32], strides = [1, 1]} : vector<96x32xf32> to vector<24x32xf32>
    %30 = vector.extract_strided_slice %28 {offsets = [24, 0], sizes = [24, 32], strides = [1, 1]} : vector<96x32xf32> to vector<24x32xf32>
    %31 = vector.extract_strided_slice %28 {offsets = [48, 0], sizes = [24, 32], strides = [1, 1]} : vector<96x32xf32> to vector<24x32xf32>
    %32 = vector.extract_strided_slice %28 {offsets = [72, 0], sizes = [24, 32], strides = [1, 1]} : vector<96x32xf32> to vector<24x32xf32>
    %33 = tpu.concatenate %29, %30, %31, %32 in 1 : vector<24x32xf32>, vector<24x32xf32>, vector<24x32xf32>, vector<24x32xf32> -> vector<24x128xf32>
    %c64 = arith.constant 64 : index
    %c0_25 = arith.constant 0 : index
    %34 = vector.load %arg3[%c64, %c0_25] : memref<1208x32xf32, #tpu.memory_space<vmem>>, vector<128x32xf32>
    %cst_26 = arith.constant dense<0.000000e+00> : vector<24x32xf32>
    %35 = tpu.matmul %33, %34, %cst_26 {dimension_numbers = #tpu.dot_dimension_numbers<[1], [0], [0], [1], [0, 0, 1, 1], [], []>} : vector<24x128xf32>, vector<128x32xf32>, vector<24x32xf32> -> vector<24x32xf32>
    %c192 = arith.constant 192 : index
    %c0_27 = arith.constant 0 : index
    %36 = vector.load %arg3[%c192, %c0_27] : memref<1208x32xf32, #tpu.memory_space<vmem>>, vector<1x32xf32>
    %37 = vector.broadcast %36 : vector<1x32xf32> to vector<24x32xf32>
    %38 = arith.addf %35, %37 : vector<24x32xf32>
    %cst_28 = arith.constant 0.000000e+00 : f32
    %39 = vector.broadcast %cst_28 : f32 to vector<24x32xf32>
    %40 = arith.maximumf %38, %39 : vector<24x32xf32>
    %cst_29 = arith.constant dense<0.000000e+00> : vector<8x32xf32>
    %41 = tpu.matmul %6, %40, %cst_29 {dimension_numbers = #tpu.dot_dimension_numbers<[1], [0], [0], [1], [0, 0, 1, 1], [], []>} : vector<8x24xf32>, vector<24x32xf32>, vector<8x32xf32> -> vector<8x32xf32>
    %c200 = arith.constant 200 : index
    %c0_30 = arith.constant 0 : index
    %42 = vector.load %arg3[%c200, %c0_30] : memref<1208x32xf32, #tpu.memory_space<vmem>>, vector<32x32xf32>
    %cst_31 = arith.constant dense<0.000000e+00> : vector<8x32xf32>
    %43 = tpu.matmul %41, %42, %cst_31 {dimension_numbers = #tpu.dot_dimension_numbers<[1], [0], [0], [1], [0, 0, 1, 1], [], []>} : vector<8x32xf32>, vector<32x32xf32>, vector<8x32xf32> -> vector<8x32xf32>
    %c232 = arith.constant 232 : index
    %c0_32 = arith.constant 0 : index
    %44 = vector.load %arg3[%c232, %c0_32] : memref<1208x32xf32, #tpu.memory_space<vmem>>, vector<1x32xf32>
    %45 = vector.broadcast %44 : vector<1x32xf32> to vector<8x32xf32>
    %46 = arith.addf %43, %45 : vector<8x32xf32>
    %cst_33 = arith.constant 0.000000e+00 : f32
    %47 = vector.broadcast %cst_33 : f32 to vector<8x32xf32>
    %48 = arith.maximumf %46, %47 : vector<8x32xf32>
    %c240 = arith.constant 240 : index
    %c0_34 = arith.constant 0 : index
    %49 = vector.load %arg3[%c240, %c0_34] : memref<1208x32xf32, #tpu.memory_space<vmem>>, vector<32x32xf32>
    %cst_35 = arith.constant dense<0.000000e+00> : vector<8x32xf32>
    %50 = tpu.matmul %48, %49, %cst_35 {dimension_numbers = #tpu.dot_dimension_numbers<[1], [0], [0], [1], [0, 0, 1, 1], [], []>} : vector<8x32xf32>, vector<32x32xf32>, vector<8x32xf32> -> vector<8x32xf32>
    %c272 = arith.constant 272 : index
    %c0_36 = arith.constant 0 : index
    %51 = vector.load %arg3[%c272, %c0_36] : memref<1208x32xf32, #tpu.memory_space<vmem>>, vector<1x32xf32>
    %52 = vector.broadcast %51 : vector<1x32xf32> to vector<8x32xf32>
    %53 = arith.addf %50, %52 : vector<8x32xf32>
    %54 = vector.broadcast %4 : vector<16x1xf32> to vector<16x32xf32>
    %55 = arith.mulf %27, %54 : vector<16x32xf32>
    %cst_37 = arith.constant dense<0.000000e+00> : vector<16x32xf32>
    %56 = tpu.matmul %3, %53, %cst_37 {dimension_numbers = #tpu.dot_dimension_numbers<[1], [0], [0], [1], [0, 0, 1, 1], [], []>} : vector<16x8xf32>, vector<8x32xf32>, vector<16x32xf32> -> vector<16x32xf32>
    %57 = arith.addf %55, %56 : vector<16x32xf32>
    %cst_38 = arith.constant dense<0.000000e+00> : vector<16x32xf32>
    %58 = tpu.matmul %0, %57, %cst_38 {dimension_numbers = #tpu.dot_dimension_numbers<[1], [0], [0], [1], [0, 0, 1, 1], [], []>} : vector<16x16xf32>, vector<16x32xf32>, vector<16x32xf32> -> vector<16x32xf32>
    %59 = vector.extract_strided_slice %19 {offsets = [8, 0], sizes = [8, 32], strides = [1, 1]} : vector<16x32xf32> to vector<8x32xf32>
    %60 = vector.extract_strided_slice %19 {offsets = [0, 0], sizes = [8, 32], strides = [1, 1]} : vector<16x32xf32> to vector<8x32xf32>
    %61 = tpu.concatenate %59, %60 in 0 : vector<8x32xf32>, vector<8x32xf32> -> vector<16x32xf32>
    %62 = arith.subf %58, %61 : vector<16x32xf32>
    %c1048 = arith.constant 1048 : index
    %c0_39 = arith.constant 0 : index
    %63 = vector.load %arg3[%c1048, %c0_39] : memref<1208x32xf32, #tpu.memory_space<vmem>>, vector<32x32xf32>
    %cst_40 = arith.constant dense<0.000000e+00> : vector<16x32xf32>
    %64 = tpu.matmul %62, %63, %cst_40 {dimension_numbers = #tpu.dot_dimension_numbers<[1], [0], [0], [1], [0, 0, 1, 1], [], []>} : vector<16x32xf32>, vector<32x32xf32>, vector<16x32xf32> -> vector<16x32xf32>
    %c1080 = arith.constant 1080 : index
    %c0_41 = arith.constant 0 : index
    %65 = vector.load %arg3[%c1080, %c0_41] : memref<1208x32xf32, #tpu.memory_space<vmem>>, vector<1x32xf32>
    %66 = vector.broadcast %65 : vector<1x32xf32> to vector<16x32xf32>
    %67 = arith.addf %64, %66 : vector<16x32xf32>
    %cst_42 = arith.constant 0.000000e+00 : f32
    %68 = vector.broadcast %cst_42 : f32 to vector<16x32xf32>
    %69 = arith.maximumf %67, %68 : vector<16x32xf32>
    %cst_43 = arith.constant 2.000000e+00 : f32
    %70 = vector.broadcast %cst_43 : f32 to vector<16x32xf32>
    %71 = arith.mulf %70, %69 : vector<16x32xf32>
    %c280 = arith.constant 280 : index
    %c0_44 = arith.constant 0 : index
    %72 = vector.load %arg3[%c280, %c0_44] : memref<1208x32xf32, #tpu.memory_space<vmem>>, vector<32x32xf32>
    %cst_45 = arith.constant dense<0.000000e+00> : vector<16x32xf32>
    %73 = tpu.matmul %71, %72, %cst_45 {dimension_numbers = #tpu.dot_dimension_numbers<[1], [0], [0], [1], [0, 0, 1, 1], [], []>} : vector<16x32xf32>, vector<32x32xf32>, vector<16x32xf32> -> vector<16x32xf32>
    %c312 = arith.constant 312 : index
    %c0_46 = arith.constant 0 : index
    %74 = vector.load %arg3[%c312, %c0_46] : memref<1208x32xf32, #tpu.memory_space<vmem>>, vector<1x32xf32>
    %75 = vector.broadcast %74 : vector<1x32xf32> to vector<16x32xf32>
    %76 = arith.addf %73, %75 : vector<16x32xf32>
    %cst_47 = arith.constant 0.000000e+00 : f32
    %77 = vector.broadcast %cst_47 : f32 to vector<16x32xf32>
    %78 = arith.maximumf %76, %77 : vector<16x32xf32>
    %cst_48 = arith.constant dense<0.000000e+00> : vector<16x32xf32>
    %79 = tpu.matmul %1, %78, %cst_48 {dimension_numbers = #tpu.dot_dimension_numbers<[1], [0], [0], [1], [0, 0, 1, 1], [], []>} : vector<16x16xf32>, vector<16x32xf32>, vector<16x32xf32> -> vector<16x32xf32>
    %cst_49 = arith.constant dense<0.000000e+00> : vector<96x32xf32>
    %80 = tpu.matmul %2, %71, %cst_49 {dimension_numbers = #tpu.dot_dimension_numbers<[1], [0], [0], [1], [0, 0, 1, 1], [], []>} : vector<96x16xf32>, vector<16x32xf32>, vector<96x32xf32> -> vector<96x32xf32>
    %81 = vector.extract_strided_slice %80 {offsets = [0, 0], sizes = [24, 32], strides = [1, 1]} : vector<96x32xf32> to vector<24x32xf32>
    %82 = vector.extract_strided_slice %80 {offsets = [24, 0], sizes = [24, 32], strides = [1, 1]} : vector<96x32xf32> to vector<24x32xf32>
    %83 = vector.extract_strided_slice %80 {offsets = [48, 0], sizes = [24, 32], strides = [1, 1]} : vector<96x32xf32> to vector<24x32xf32>
    %84 = vector.extract_strided_slice %80 {offsets = [72, 0], sizes = [24, 32], strides = [1, 1]} : vector<96x32xf32> to vector<24x32xf32>
    %85 = tpu.concatenate %81, %82, %83, %84 in 1 : vector<24x32xf32>, vector<24x32xf32>, vector<24x32xf32>, vector<24x32xf32> -> vector<24x128xf32>
    %c320 = arith.constant 320 : index
    %c0_50 = arith.constant 0 : index
    %86 = vector.load %arg3[%c320, %c0_50] : memref<1208x32xf32, #tpu.memory_space<vmem>>, vector<128x32xf32>
    %cst_51 = arith.constant dense<0.000000e+00> : vector<24x32xf32>
    %87 = tpu.matmul %85, %86, %cst_51 {dimension_numbers = #tpu.dot_dimension_numbers<[1], [0], [0], [1], [0, 0, 1, 1], [], []>} : vector<24x128xf32>, vector<128x32xf32>, vector<24x32xf32> -> vector<24x32xf32>
    %c448 = arith.constant 448 : index
    %c0_52 = arith.constant 0 : index
    %88 = vector.load %arg3[%c448, %c0_52] : memref<1208x32xf32, #tpu.memory_space<vmem>>, vector<1x32xf32>
    %89 = vector.broadcast %88 : vector<1x32xf32> to vector<24x32xf32>
    %90 = arith.addf %87, %89 : vector<24x32xf32>
    %cst_53 = arith.constant 0.000000e+00 : f32
    %91 = vector.broadcast %cst_53 : f32 to vector<24x32xf32>
    %92 = arith.maximumf %90, %91 : vector<24x32xf32>
    %cst_54 = arith.constant dense<0.000000e+00> : vector<8x32xf32>
    %93 = tpu.matmul %6, %92, %cst_54 {dimension_numbers = #tpu.dot_dimension_numbers<[1], [0], [0], [1], [0, 0, 1, 1], [], []>} : vector<8x24xf32>, vector<24x32xf32>, vector<8x32xf32> -> vector<8x32xf32>
    %c456 = arith.constant 456 : index
    %c0_55 = arith.constant 0 : index
    %94 = vector.load %arg3[%c456, %c0_55] : memref<1208x32xf32, #tpu.memory_space<vmem>>, vector<32x32xf32>
    %cst_56 = arith.constant dense<0.000000e+00> : vector<8x32xf32>
    %95 = tpu.matmul %93, %94, %cst_56 {dimension_numbers = #tpu.dot_dimension_numbers<[1], [0], [0], [1], [0, 0, 1, 1], [], []>} : vector<8x32xf32>, vector<32x32xf32>, vector<8x32xf32> -> vector<8x32xf32>
    %c488 = arith.constant 488 : index
    %c0_57 = arith.constant 0 : index
    %96 = vector.load %arg3[%c488, %c0_57] : memref<1208x32xf32, #tpu.memory_space<vmem>>, vector<1x32xf32>
    %97 = vector.broadcast %96 : vector<1x32xf32> to vector<8x32xf32>
    %98 = arith.addf %95, %97 : vector<8x32xf32>
    %cst_58 = arith.constant 0.000000e+00 : f32
    %99 = vector.broadcast %cst_58 : f32 to vector<8x32xf32>
    %100 = arith.maximumf %98, %99 : vector<8x32xf32>
    %c496 = arith.constant 496 : index
    %c0_59 = arith.constant 0 : index
    %101 = vector.load %arg3[%c496, %c0_59] : memref<1208x32xf32, #tpu.memory_space<vmem>>, vector<32x32xf32>
    %cst_60 = arith.constant dense<0.000000e+00> : vector<8x32xf32>
    %102 = tpu.matmul %100, %101, %cst_60 {dimension_numbers = #tpu.dot_dimension_numbers<[1], [0], [0], [1], [0, 0, 1, 1], [], []>} : vector<8x32xf32>, vector<32x32xf32>, vector<8x32xf32> -> vector<8x32xf32>
    %c528 = arith.constant 528 : index
    %c0_61 = arith.constant 0 : index
    %103 = vector.load %arg3[%c528, %c0_61] : memref<1208x32xf32, #tpu.memory_space<vmem>>, vector<1x32xf32>
    %104 = vector.broadcast %103 : vector<1x32xf32> to vector<8x32xf32>
    %105 = arith.addf %102, %104 : vector<8x32xf32>
    %106 = vector.broadcast %4 : vector<16x1xf32> to vector<16x32xf32>
    %107 = arith.mulf %79, %106 : vector<16x32xf32>
    %cst_62 = arith.constant dense<0.000000e+00> : vector<16x32xf32>
    %108 = tpu.matmul %3, %105, %cst_62 {dimension_numbers = #tpu.dot_dimension_numbers<[1], [0], [0], [1], [0, 0, 1, 1], [], []>} : vector<16x8xf32>, vector<8x32xf32>, vector<16x32xf32> -> vector<16x32xf32>
    %109 = arith.addf %107, %108 : vector<16x32xf32>
    %cst_63 = arith.constant dense<0.000000e+00> : vector<16x32xf32>
    %110 = tpu.matmul %0, %109, %cst_63 {dimension_numbers = #tpu.dot_dimension_numbers<[1], [0], [0], [1], [0, 0, 1, 1], [], []>} : vector<16x16xf32>, vector<16x32xf32>, vector<16x32xf32> -> vector<16x32xf32>
    %111 = vector.extract_strided_slice %71 {offsets = [8, 0], sizes = [8, 32], strides = [1, 1]} : vector<16x32xf32> to vector<8x32xf32>
    %112 = vector.extract_strided_slice %71 {offsets = [0, 0], sizes = [8, 32], strides = [1, 1]} : vector<16x32xf32> to vector<8x32xf32>
    %113 = tpu.concatenate %111, %112 in 0 : vector<8x32xf32>, vector<8x32xf32> -> vector<16x32xf32>
    %114 = arith.subf %110, %113 : vector<16x32xf32>
    %c1088 = arith.constant 1088 : index
    %c0_64 = arith.constant 0 : index
    %115 = vector.load %arg3[%c1088, %c0_64] : memref<1208x32xf32, #tpu.memory_space<vmem>>, vector<32x32xf32>
    %cst_65 = arith.constant dense<0.000000e+00> : vector<16x32xf32>
    %116 = tpu.matmul %114, %115, %cst_65 {dimension_numbers = #tpu.dot_dimension_numbers<[1], [0], [0], [1], [0, 0, 1, 1], [], []>} : vector<16x32xf32>, vector<32x32xf32>, vector<16x32xf32> -> vector<16x32xf32>
    %c1120 = arith.constant 1120 : index
    %c0_66 = arith.constant 0 : index
    %117 = vector.load %arg3[%c1120, %c0_66] : memref<1208x32xf32, #tpu.memory_space<vmem>>, vector<1x32xf32>
    %118 = vector.broadcast %117 : vector<1x32xf32> to vector<16x32xf32>
    %119 = arith.addf %116, %118 : vector<16x32xf32>
    %cst_67 = arith.constant 0.000000e+00 : f32
    %120 = vector.broadcast %cst_67 : f32 to vector<16x32xf32>
    %121 = arith.maximumf %119, %120 : vector<16x32xf32>
    %cst_68 = arith.constant 2.000000e+00 : f32
    %122 = vector.broadcast %cst_68 : f32 to vector<16x32xf32>
    %123 = arith.mulf %122, %121 : vector<16x32xf32>
    %c536 = arith.constant 536 : index
    %c0_69 = arith.constant 0 : index
    %124 = vector.load %arg3[%c536, %c0_69] : memref<1208x32xf32, #tpu.memory_space<vmem>>, vector<32x32xf32>
    %cst_70 = arith.constant dense<0.000000e+00> : vector<16x32xf32>
    %125 = tpu.matmul %123, %124, %cst_70 {dimension_numbers = #tpu.dot_dimension_numbers<[1], [0], [0], [1], [0, 0, 1, 1], [], []>} : vector<16x32xf32>, vector<32x32xf32>, vector<16x32xf32> -> vector<16x32xf32>
    %c568 = arith.constant 568 : index
    %c0_71 = arith.constant 0 : index
    %126 = vector.load %arg3[%c568, %c0_71] : memref<1208x32xf32, #tpu.memory_space<vmem>>, vector<1x32xf32>
    %127 = vector.broadcast %126 : vector<1x32xf32> to vector<16x32xf32>
    %128 = arith.addf %125, %127 : vector<16x32xf32>
    %cst_72 = arith.constant 0.000000e+00 : f32
    %129 = vector.broadcast %cst_72 : f32 to vector<16x32xf32>
    %130 = arith.maximumf %128, %129 : vector<16x32xf32>
    %cst_73 = arith.constant dense<0.000000e+00> : vector<16x32xf32>
    %131 = tpu.matmul %1, %130, %cst_73 {dimension_numbers = #tpu.dot_dimension_numbers<[1], [0], [0], [1], [0, 0, 1, 1], [], []>} : vector<16x16xf32>, vector<16x32xf32>, vector<16x32xf32> -> vector<16x32xf32>
    %cst_74 = arith.constant dense<0.000000e+00> : vector<96x32xf32>
    %132 = tpu.matmul %2, %123, %cst_74 {dimension_numbers = #tpu.dot_dimension_numbers<[1], [0], [0], [1], [0, 0, 1, 1], [], []>} : vector<96x16xf32>, vector<16x32xf32>, vector<96x32xf32> -> vector<96x32xf32>
    %133 = vector.extract_strided_slice %132 {offsets = [0, 0], sizes = [24, 32], strides = [1, 1]} : vector<96x32xf32> to vector<24x32xf32>
    %134 = vector.extract_strided_slice %132 {offsets = [24, 0], sizes = [24, 32], strides = [1, 1]} : vector<96x32xf32> to vector<24x32xf32>
    %135 = vector.extract_strided_slice %132 {offsets = [48, 0], sizes = [24, 32], strides = [1, 1]} : vector<96x32xf32> to vector<24x32xf32>
    %136 = vector.extract_strided_slice %132 {offsets = [72, 0], sizes = [24, 32], strides = [1, 1]} : vector<96x32xf32> to vector<24x32xf32>
    %137 = tpu.concatenate %133, %134, %135, %136 in 1 : vector<24x32xf32>, vector<24x32xf32>, vector<24x32xf32>, vector<24x32xf32> -> vector<24x128xf32>
    %c576 = arith.constant 576 : index
    %c0_75 = arith.constant 0 : index
    %138 = vector.load %arg3[%c576, %c0_75] : memref<1208x32xf32, #tpu.memory_space<vmem>>, vector<128x32xf32>
    %cst_76 = arith.constant dense<0.000000e+00> : vector<24x32xf32>
    %139 = tpu.matmul %137, %138, %cst_76 {dimension_numbers = #tpu.dot_dimension_numbers<[1], [0], [0], [1], [0, 0, 1, 1], [], []>} : vector<24x128xf32>, vector<128x32xf32>, vector<24x32xf32> -> vector<24x32xf32>
    %c704 = arith.constant 704 : index
    %c0_77 = arith.constant 0 : index
    %140 = vector.load %arg3[%c704, %c0_77] : memref<1208x32xf32, #tpu.memory_space<vmem>>, vector<1x32xf32>
    %141 = vector.broadcast %140 : vector<1x32xf32> to vector<24x32xf32>
    %142 = arith.addf %139, %141 : vector<24x32xf32>
    %cst_78 = arith.constant 0.000000e+00 : f32
    %143 = vector.broadcast %cst_78 : f32 to vector<24x32xf32>
    %144 = arith.maximumf %142, %143 : vector<24x32xf32>
    %cst_79 = arith.constant dense<0.000000e+00> : vector<8x32xf32>
    %145 = tpu.matmul %6, %144, %cst_79 {dimension_numbers = #tpu.dot_dimension_numbers<[1], [0], [0], [1], [0, 0, 1, 1], [], []>} : vector<8x24xf32>, vector<24x32xf32>, vector<8x32xf32> -> vector<8x32xf32>
    %c712 = arith.constant 712 : index
    %c0_80 = arith.constant 0 : index
    %146 = vector.load %arg3[%c712, %c0_80] : memref<1208x32xf32, #tpu.memory_space<vmem>>, vector<32x32xf32>
    %cst_81 = arith.constant dense<0.000000e+00> : vector<8x32xf32>
    %147 = tpu.matmul %145, %146, %cst_81 {dimension_numbers = #tpu.dot_dimension_numbers<[1], [0], [0], [1], [0, 0, 1, 1], [], []>} : vector<8x32xf32>, vector<32x32xf32>, vector<8x32xf32> -> vector<8x32xf32>
    %c744 = arith.constant 744 : index
    %c0_82 = arith.constant 0 : index
    %148 = vector.load %arg3[%c744, %c0_82] : memref<1208x32xf32, #tpu.memory_space<vmem>>, vector<1x32xf32>
    %149 = vector.broadcast %148 : vector<1x32xf32> to vector<8x32xf32>
    %150 = arith.addf %147, %149 : vector<8x32xf32>
    %cst_83 = arith.constant 0.000000e+00 : f32
    %151 = vector.broadcast %cst_83 : f32 to vector<8x32xf32>
    %152 = arith.maximumf %150, %151 : vector<8x32xf32>
    %c752 = arith.constant 752 : index
    %c0_84 = arith.constant 0 : index
    %153 = vector.load %arg3[%c752, %c0_84] : memref<1208x32xf32, #tpu.memory_space<vmem>>, vector<32x32xf32>
    %cst_85 = arith.constant dense<0.000000e+00> : vector<8x32xf32>
    %154 = tpu.matmul %152, %153, %cst_85 {dimension_numbers = #tpu.dot_dimension_numbers<[1], [0], [0], [1], [0, 0, 1, 1], [], []>} : vector<8x32xf32>, vector<32x32xf32>, vector<8x32xf32> -> vector<8x32xf32>
    %c784 = arith.constant 784 : index
    %c0_86 = arith.constant 0 : index
    %155 = vector.load %arg3[%c784, %c0_86] : memref<1208x32xf32, #tpu.memory_space<vmem>>, vector<1x32xf32>
    %156 = vector.broadcast %155 : vector<1x32xf32> to vector<8x32xf32>
    %157 = arith.addf %154, %156 : vector<8x32xf32>
    %158 = vector.broadcast %4 : vector<16x1xf32> to vector<16x32xf32>
    %159 = arith.mulf %131, %158 : vector<16x32xf32>
    %cst_87 = arith.constant dense<0.000000e+00> : vector<16x32xf32>
    %160 = tpu.matmul %3, %157, %cst_87 {dimension_numbers = #tpu.dot_dimension_numbers<[1], [0], [0], [1], [0, 0, 1, 1], [], []>} : vector<16x8xf32>, vector<8x32xf32>, vector<16x32xf32> -> vector<16x32xf32>
    %161 = arith.addf %159, %160 : vector<16x32xf32>
    %cst_88 = arith.constant dense<0.000000e+00> : vector<16x32xf32>
    %162 = tpu.matmul %0, %161, %cst_88 {dimension_numbers = #tpu.dot_dimension_numbers<[1], [0], [0], [1], [0, 0, 1, 1], [], []>} : vector<16x16xf32>, vector<16x32xf32>, vector<16x32xf32> -> vector<16x32xf32>
    %163 = vector.extract_strided_slice %123 {offsets = [8, 0], sizes = [8, 32], strides = [1, 1]} : vector<16x32xf32> to vector<8x32xf32>
    %164 = vector.extract_strided_slice %123 {offsets = [0, 0], sizes = [8, 32], strides = [1, 1]} : vector<16x32xf32> to vector<8x32xf32>
    %165 = tpu.concatenate %163, %164 in 0 : vector<8x32xf32>, vector<8x32xf32> -> vector<16x32xf32>
    %166 = arith.subf %162, %165 : vector<16x32xf32>
    %c1128 = arith.constant 1128 : index
    %c0_89 = arith.constant 0 : index
    %167 = vector.load %arg3[%c1128, %c0_89] : memref<1208x32xf32, #tpu.memory_space<vmem>>, vector<32x32xf32>
    %cst_90 = arith.constant dense<0.000000e+00> : vector<16x32xf32>
    %168 = tpu.matmul %166, %167, %cst_90 {dimension_numbers = #tpu.dot_dimension_numbers<[1], [0], [0], [1], [0, 0, 1, 1], [], []>} : vector<16x32xf32>, vector<32x32xf32>, vector<16x32xf32> -> vector<16x32xf32>
    %c1160 = arith.constant 1160 : index
    %c0_91 = arith.constant 0 : index
    %169 = vector.load %arg3[%c1160, %c0_91] : memref<1208x32xf32, #tpu.memory_space<vmem>>, vector<1x32xf32>
    %170 = vector.broadcast %169 : vector<1x32xf32> to vector<16x32xf32>
    %171 = arith.addf %168, %170 : vector<16x32xf32>
    %cst_92 = arith.constant 0.000000e+00 : f32
    %172 = vector.broadcast %cst_92 : f32 to vector<16x32xf32>
    %173 = arith.maximumf %171, %172 : vector<16x32xf32>
    %cst_93 = arith.constant 2.000000e+00 : f32
    %174 = vector.broadcast %cst_93 : f32 to vector<16x32xf32>
    %175 = arith.mulf %174, %173 : vector<16x32xf32>
    %c792 = arith.constant 792 : index
    %c0_94 = arith.constant 0 : index
    %176 = vector.load %arg3[%c792, %c0_94] : memref<1208x32xf32, #tpu.memory_space<vmem>>, vector<32x32xf32>
    %cst_95 = arith.constant dense<0.000000e+00> : vector<16x32xf32>
    %177 = tpu.matmul %175, %176, %cst_95 {dimension_numbers = #tpu.dot_dimension_numbers<[1], [0], [0], [1], [0, 0, 1, 1], [], []>} : vector<16x32xf32>, vector<32x32xf32>, vector<16x32xf32> -> vector<16x32xf32>
    %c824 = arith.constant 824 : index
    %c0_96 = arith.constant 0 : index
    %178 = vector.load %arg3[%c824, %c0_96] : memref<1208x32xf32, #tpu.memory_space<vmem>>, vector<1x32xf32>
    %179 = vector.broadcast %178 : vector<1x32xf32> to vector<16x32xf32>
    %180 = arith.addf %177, %179 : vector<16x32xf32>
    %cst_97 = arith.constant 0.000000e+00 : f32
    %181 = vector.broadcast %cst_97 : f32 to vector<16x32xf32>
    %182 = arith.maximumf %180, %181 : vector<16x32xf32>
    %cst_98 = arith.constant dense<0.000000e+00> : vector<16x32xf32>
    %183 = tpu.matmul %1, %182, %cst_98 {dimension_numbers = #tpu.dot_dimension_numbers<[1], [0], [0], [1], [0, 0, 1, 1], [], []>} : vector<16x16xf32>, vector<16x32xf32>, vector<16x32xf32> -> vector<16x32xf32>
    %cst_99 = arith.constant dense<0.000000e+00> : vector<96x32xf32>
    %184 = tpu.matmul %2, %175, %cst_99 {dimension_numbers = #tpu.dot_dimension_numbers<[1], [0], [0], [1], [0, 0, 1, 1], [], []>} : vector<96x16xf32>, vector<16x32xf32>, vector<96x32xf32> -> vector<96x32xf32>
    %185 = vector.extract_strided_slice %184 {offsets = [0, 0], sizes = [24, 32], strides = [1, 1]} : vector<96x32xf32> to vector<24x32xf32>
    %186 = vector.extract_strided_slice %184 {offsets = [24, 0], sizes = [24, 32], strides = [1, 1]} : vector<96x32xf32> to vector<24x32xf32>
    %187 = vector.extract_strided_slice %184 {offsets = [48, 0], sizes = [24, 32], strides = [1, 1]} : vector<96x32xf32> to vector<24x32xf32>
    %188 = vector.extract_strided_slice %184 {offsets = [72, 0], sizes = [24, 32], strides = [1, 1]} : vector<96x32xf32> to vector<24x32xf32>
    %189 = tpu.concatenate %185, %186, %187, %188 in 1 : vector<24x32xf32>, vector<24x32xf32>, vector<24x32xf32>, vector<24x32xf32> -> vector<24x128xf32>
    %c832 = arith.constant 832 : index
    %c0_100 = arith.constant 0 : index
    %190 = vector.load %arg3[%c832, %c0_100] : memref<1208x32xf32, #tpu.memory_space<vmem>>, vector<128x32xf32>
    %cst_101 = arith.constant dense<0.000000e+00> : vector<24x32xf32>
    %191 = tpu.matmul %189, %190, %cst_101 {dimension_numbers = #tpu.dot_dimension_numbers<[1], [0], [0], [1], [0, 0, 1, 1], [], []>} : vector<24x128xf32>, vector<128x32xf32>, vector<24x32xf32> -> vector<24x32xf32>
    %c960 = arith.constant 960 : index
    %c0_102 = arith.constant 0 : index
    %192 = vector.load %arg3[%c960, %c0_102] : memref<1208x32xf32, #tpu.memory_space<vmem>>, vector<1x32xf32>
    %193 = vector.broadcast %192 : vector<1x32xf32> to vector<24x32xf32>
    %194 = arith.addf %191, %193 : vector<24x32xf32>
    %cst_103 = arith.constant 0.000000e+00 : f32
    %195 = vector.broadcast %cst_103 : f32 to vector<24x32xf32>
    %196 = arith.maximumf %194, %195 : vector<24x32xf32>
    %cst_104 = arith.constant dense<0.000000e+00> : vector<8x32xf32>
    %197 = tpu.matmul %6, %196, %cst_104 {dimension_numbers = #tpu.dot_dimension_numbers<[1], [0], [0], [1], [0, 0, 1, 1], [], []>} : vector<8x24xf32>, vector<24x32xf32>, vector<8x32xf32> -> vector<8x32xf32>
    %c968 = arith.constant 968 : index
    %c0_105 = arith.constant 0 : index
    %198 = vector.load %arg3[%c968, %c0_105] : memref<1208x32xf32, #tpu.memory_space<vmem>>, vector<32x32xf32>
    %cst_106 = arith.constant dense<0.000000e+00> : vector<8x32xf32>
    %199 = tpu.matmul %197, %198, %cst_106 {dimension_numbers = #tpu.dot_dimension_numbers<[1], [0], [0], [1], [0, 0, 1, 1], [], []>} : vector<8x32xf32>, vector<32x32xf32>, vector<8x32xf32> -> vector<8x32xf32>
    %c1000 = arith.constant 1000 : index
    %c0_107 = arith.constant 0 : index
    %200 = vector.load %arg3[%c1000, %c0_107] : memref<1208x32xf32, #tpu.memory_space<vmem>>, vector<1x32xf32>
    %201 = vector.broadcast %200 : vector<1x32xf32> to vector<8x32xf32>
    %202 = arith.addf %199, %201 : vector<8x32xf32>
    %cst_108 = arith.constant 0.000000e+00 : f32
    %203 = vector.broadcast %cst_108 : f32 to vector<8x32xf32>
    %204 = arith.maximumf %202, %203 : vector<8x32xf32>
    %c1008 = arith.constant 1008 : index
    %c0_109 = arith.constant 0 : index
    %205 = vector.load %arg3[%c1008, %c0_109] : memref<1208x32xf32, #tpu.memory_space<vmem>>, vector<32x32xf32>
    %cst_110 = arith.constant dense<0.000000e+00> : vector<8x32xf32>
    %206 = tpu.matmul %204, %205, %cst_110 {dimension_numbers = #tpu.dot_dimension_numbers<[1], [0], [0], [1], [0, 0, 1, 1], [], []>} : vector<8x32xf32>, vector<32x32xf32>, vector<8x32xf32> -> vector<8x32xf32>
    %c1040 = arith.constant 1040 : index
    %c0_111 = arith.constant 0 : index
    %207 = vector.load %arg3[%c1040, %c0_111] : memref<1208x32xf32, #tpu.memory_space<vmem>>, vector<1x32xf32>
    %208 = vector.broadcast %207 : vector<1x32xf32> to vector<8x32xf32>
    %209 = arith.addf %206, %208 : vector<8x32xf32>
    %210 = vector.broadcast %4 : vector<16x1xf32> to vector<16x32xf32>
    %211 = arith.mulf %183, %210 : vector<16x32xf32>
    %cst_112 = arith.constant dense<0.000000e+00> : vector<16x32xf32>
    %212 = tpu.matmul %3, %209, %cst_112 {dimension_numbers = #tpu.dot_dimension_numbers<[1], [0], [0], [1], [0, 0, 1, 1], [], []>} : vector<16x8xf32>, vector<8x32xf32>, vector<16x32xf32> -> vector<16x32xf32>
    %213 = arith.addf %211, %212 : vector<16x32xf32>
    %c1168 = arith.constant 1168 : index
    %c0_113 = arith.constant 0 : index
    %214 = vector.load %arg3[%c1168, %c0_113] : memref<1208x32xf32, #tpu.memory_space<vmem>>, vector<32x1xf32>
    %cst_114 = arith.constant dense<0.000000e+00> : vector<16x1xf32>
    %215 = tpu.matmul %213, %214, %cst_114 {dimension_numbers = #tpu.dot_dimension_numbers<[1], [0], [0], [1], [0, 0, 1, 1], [], []>} : vector<16x32xf32>, vector<32x1xf32>, vector<16x1xf32> -> vector<16x1xf32>
    %cst_115 = arith.constant dense<0.000000e+00> : vector<8x1xf32>
    %216 = tpu.matmul %5, %215, %cst_115 {dimension_numbers = #tpu.dot_dimension_numbers<[1], [0], [0], [1], [0, 0, 1, 1], [], []>} : vector<8x16xf32>, vector<16x1xf32>, vector<8x1xf32> -> vector<8x1xf32>
    %c1200 = arith.constant 1200 : index
    %c0_116 = arith.constant 0 : index
    %217 = vector.load %arg3[%c1200, %c0_116] : memref<1208x32xf32, #tpu.memory_space<vmem>>, vector<1x1xf32>
    %218 = vector.broadcast %217 : vector<1x1xf32> to vector<8x1xf32>
    %219 = arith.addf %216, %218 : vector<8x1xf32>
    %c0_117 = arith.constant 0 : index
    %c0_118 = arith.constant 0 : index
    %220 = vector.load %arg4[%c0_117, %c0_118] : memref<8x1xf32, #tpu.memory_space<vmem>>, vector<8x1xf32>
    tpu.vector_store %arg4[%c0_117, %c0_118], %219 {strides = array<i32>} : memref<8x1xf32, #tpu.memory_space<vmem>>, vector<8x1xf32>,
    return
  }
}

</mosaic_0001>

<bundles_post_ra>
// kernel: forward.1
= control target key start
LH: loop header
LB: loop body
LE: loop exit
PB: predicated region body
PF: predicated region fallthrough
CT: control target
= control target key end

     0   :  { %9 = vsyncpa [#allocation3], 0  ;;  %s5972_s0 = inlined_call_operand.vmem [shape: f32[16,8], index: 0, kind: input, shape index: {}]   ;;  %s5973_s1 = inlined_call_operand.vmem [shape: f32[16,4], index: 1, kind: input, shape index: {}]   ;;  %s5974_s2 = inlined_call_operand.hbm [shape: f32[176,128], index: 2, kind: input, shape index: {}]   ;;  %s5975_s3 = inlined_call_operand.hbm [shape: f32[1208,32], index: 3, kind: input, shape index: {}]   ;;  %s5976_s4 = inlined_call_operand.vmem [shape: f32[8,1], index: 4, kind: output, shape index: {}]  }
   0x1   :  { %10 = vsyncpa [#allocation5], 0  ;;  %s5427_s15 = smov [#allocation2]   ;;  %s5379_s19 = scalar_lea.hbm %s5974_s2, 2816 }
   0x2   :  { %s20_s16 = sshll.u32 %s5427_s15, 4  ;;  %p5380_p0 = scmp.ne.s32.totalorder %s5974_s2, %s5379_s19  ;;  %s21_s16 = int_to_ptr.vmem [resolvable:$true] %s20_s16 }
   0x3   :  { %p5383_p1 = scmp.lt.u32.totalorder %s5379_s19, %s5974_s2 }
   0x5   :  { %p5385_p2 = pnand %p5383_p1, %p5380_p0 }
   0x7   :  { %5388 = shalt.err (!%p5385_p2)
}
   0x8   :  { %s5389_s24 = scalar_lea.vmem %s21_s16, 2816  ;;  %p5394_p4 = scmp.lt.s32.totalorder %s21_s16, %s21_s16 }
   0x9   :  { %p5390_p3 = scmp.ne.s32.totalorder %s21_s16, %s5389_s24  ;;  %p5395_p5 = scmp.lt.s32.totalorder %s5389_s24, %s5389_s24 }
   0xb   :  { %p5396_p6 = por %p5395_p5, %p5394_p4 }
   0xd   :  { %p5397_p7 = pnand %p5396_p6, %p5390_p3 }
   0xf   :  { %5400 = shalt.err (!%p5397_p7)
}
  0x10   :  { %s5428_s25 = smov 128   ;;  %s5429_s26 = smov 8  }
  0x11   :  { %26 = dma.hbm_to_vmem [thread:$0]  %s5974_s2, 2816, %s21_s16, [#allocation3], %s5428_s25, %s5428_s25, %s5429_s26  }
  0x12   :  { %s5430_s29 = smov [#allocation4]   ;;  %s5401_s7 = scalar_lea.hbm %s5975_s3, 19328 }
  0x13   :  { %s32_s30 = sshll.u32 %s5430_s29, 4  ;;  %p5402_p8 = scmp.ne.s32.totalorder %s5975_s3, %s5401_s7  ;;  %s33_s30 = int_to_ptr.vmem [resolvable:$true] %s32_s30 }
  0x14   :  { %p5405_p9 = scmp.lt.u32.totalorder %s5401_s7, %s5975_s3 }
  0x16   :  { %p5407_p10 = pnand %p5405_p9, %p5402_p8 }
  0x18   :  { %5410 = shalt.err (!%p5407_p10)
}
  0x19   :  { %s5411_s12 = scalar_lea.vmem %s33_s30, 19328  ;;  %p5416_p12 = scmp.lt.s32.totalorder %s33_s30, %s33_s30 }
  0x1a   :  { %p5412_p11 = scmp.ne.s32.totalorder %s33_s30, %s5411_s12  ;;  %p5417_p13 = scmp.lt.s32.totalorder %s5411_s12, %s5411_s12 }
  0x1c   :  { %p5418_p0 = por %p5417_p13, %p5416_p12 }
  0x1e   :  { %p5419_p1 = pnand %p5418_p0, %p5412_p11 }
  0x20   :  { %5422 = shalt.err (!%p5419_p1)
}
  0x21   :  { %38 = dma.hbm_to_vmem [thread:$0]  %s5975_s3, 19328, %s33_s30, [#allocation5], %s5428_s25, %s5428_s25, %s5429_s26  }
  0x22   :  { %5423 = dma.done.wait [#allocation3], 2816  }
  0x23   :  { %5424 = vsyncadd [#allocation3], 4294964480 }
  0x24   :  { %5425 = dma.done.wait [#allocation5], 19328  }
  0x25   :  { %5426 = vsyncadd [#allocation5], 4294947968  ;;  %vm69_vm0 = vcmask 130048   ;;  %vm162_vm1 = vcmask 1043456   ;;  %vm155_vm2 = vcmask 31744   ;;  %v67_v0 = vld [vmem:[%s5972_s0] sm:$0xff] }
  0x26   :  { %v68_v1 = vld [vmem:[%s5972_s0 + $0x8] sm:$0xff]  ;;  %v5493_v2 = vld [vmem:[#allocation2] sm:$0xff]  ;;  %v154_v4 = vld [vmem:[#allocation4 + $0x8] sm:$0xf]  ;;  %vm241_vm3 = vcmask 64512   ;;  %vm341_vm4 = vcmask 261120  }
  0x27   :  { %v5074_v3 = vpack.c.bf16 %v68_v1, %v67_v0  ;;  %4521 = vmatprep.mubr.msk.f32.mxu0 %vm69_vm0, %v5493_v2  ;;  %v152_v5 = vld [vmem:[%s5973_s1] sm:$0xff]  ;;  %4524 = vmatprep.subr.msk.mxu1 %vm162_vm1, %v154_v4  ;;  %v153_v6 = vld [vmem:[%s5973_s1 + $0x8] sm:$0xff]  ;;  %v151_v8 = vld [vmem:[#allocation4] sm:$0xff]  ;;  %v5431_v47 = vmov 0   ;;  %v5432_v51 = vmov 0.0|0.0   ;;  %vm5433_vm5 = vmmov 0  }
  0x28   :  { %4526 = vmatprep.mubr.msk.f32.mxu1 %vm155_vm2, %v152_v5  ;;  %4525 = vmatpush3.msk.msra.mxu1 %vm162_vm1, %v154_v4  ;;  %v5503_v7 = vld [vmem:[#allocation2 + $0x8] sm:$0xff]  ;;  %v333_v10 = vld [vmem:[#allocation4 + $0x20] sm:$0xff]  ;;  %v334_v14 = vld [vmem:[#allocation4 + $0x28] sm:$0xff]  ;;  %s5435_s0 = smov 32   ;;  %s5436_s1 = smov 64   ;;  %vm706_vm6 = vcmask 523264  }
  0x29   :  { %5075 = vmatprep.subr.bf16.mxu0 %v5074_v3  ;;  %4527 = vmatmul.mubr.msk.f32.vlgmr.msra.gmra.mrb[0].mxu1 %vm155_vm2, %v153_v6  ;;  %v332_v9 = vld [vmem:[#allocation4 + $0x18] sm:$0xff]  ;;  %v335_v15 = vld [vmem:[#allocation4 + $0x30] sm:$0xff]  ;;  %v5517_v24 = vld [vmem:[#allocation2 + $0x10] sm:$0xff]  ;;  %s5437_s21 = smov 96   ;;  %vm710_vm7 = vcmask 785408   ;;  %vm818_vm8 = vcmask 195584  }
  0x2a   :  { %5077 = vmatpush3.bf16.msra.mxu0 %v5074_v3  ;;  %4529 = vmatprep.subr.mxu1 %v151_v8  ;;  %v5078_v11 = vpack.c.bf16 %v333_v10, %v332_v9  ;;  %v5082_v16 = vpack.c.bf16 %v335_v15, %v334_v14  ;;  %v4108_v17 = vld [vmem:[#allocation4 + $0x10] ss:$0 sm:$0xff]  ;;  %v4109_v25 = vld [vmem:[#allocation4 + $0x38] ss:$0 sm:$0xff]  ;;  %v5523_v34 = vld [vmem:[#allocation2 + $0x18] sm:$0xff]  ;;  %vm4093_vm9 = vcmask 7168  }
  0x2b   :  { %4530 = vmatpush3.msra.mxu1 %v151_v8  ;;  %v5525_v35 = vld [vmem:[#allocation2 + $0x20] sm:$0xff]  ;;  %v5531_v36 = vld [vmem:[#allocation2 + $0x28] sm:$0xff]  ;;  %v5533_v37 = vld [vmem:[#allocation2 + $0x30] sm:$0xff]  ;;  %5359 = vset.pattern.permute.xlu0 %v5431_v47 }
  0x2c   :  { %5079 = vmatprep.subr.bf16.mxu0 %v5078_v11  ;;  %v5539_v38 = vld [vmem:[#allocation2 + $0x38] sm:$0xff]  ;;  %v5541_v39 = vld [vmem:[#allocation2 + $0x40] sm:$0xff]  ;;  %v5547_v40 = vld [vmem:[#allocation2 + $0x48] sm:$0xff]  ;;  %5358 = vset.pattern.permute.xlu1 %v5431_v47 }
  0x2d   :  { %4522 = vmatmul.mubr.msk.f32.vlgmr.msra.gmra.mrb[0].mxu0 %vm69_vm0, %v5503_v7  ;;  %v5549_v41 = vld [vmem:[#allocation2 + $0x50] sm:$0xff]  ;;  %v5555_v42 = vld [vmem:[#allocation2 + $0x58] sm:$0xff]  ;;  %v5557_v43 = vld [vmem:[#allocation2 + $0x60] sm:$0xff] }
  0x2e   :  { %5081 = vmatpush3.bf16.msra.mxu0 %v5078_v11  ;;  %v5563_v44 = vld [vmem:[#allocation2 + $0x68] sm:$0xff]  ;;  %v5565_v45 = vld [vmem:[#allocation2 + $0x70] sm:$0xff]  ;;  %v5571_v46 = vld [vmem:[#allocation2 + $0x78] sm:$0xff] }
  0x2f   :  { %5083 = vmatprep.subr.bf16.mxu0 %v5082_v16  ;;  %v714_v48 = vld [vmem:[#allocation4 + $0x40] sm:$0xff]  ;;  %v715_v49 = vld [vmem:[#allocation4 + $0x48] sm:$0xff]  ;;  %v716_v50 = vld [vmem:[#allocation4 + $0x50] sm:$0xff] }
  0x30   :  { %v5095_v52 = vpack.c.bf16 %v715_v49, %v714_v48  ;;  %v717_v53 = vld [vmem:[#allocation4 + $0x58] sm:$0xff]  ;;  %v718_v55 = vld [vmem:[#allocation4 + $0x60] sm:$0xff]  ;;  %v719_v56 = vld [vmem:[#allocation4 + $0x68] sm:$0xff] }
  0x31   :  { %v5098_v54 = vpack.c.bf16 %v717_v53, %v716_v50  ;;  %v5101_v57 = vpack.c.bf16 %v719_v56, %v718_v55  ;;  %v720_v58 = vld [vmem:[#allocation4 + $0x70] sm:$0xff]  ;;  %v721_v59 = vld [vmem:[#allocation4 + $0x78] sm:$0xff]  ;;  %v722_v61 = vld [vmem:[#allocation4 + $0x80] sm:$0xff] }
  0x32   :  { %5085 = vmatpush3.bf16.msra.mxu0 %v5082_v16  ;;  %v5104_v60 = vpack.c.bf16 %v721_v59, %v720_v58  ;;  %v723_v62 = vld [vmem:[#allocation4 + $0x88] sm:$0xff]  ;;  %v724_v0 = vld [vmem:[#allocation4 + $0x90] sm:$0xff]  ;;  %v725_v1 = vld [vmem:[#allocation4 + $0x98] sm:$0xff]  ;;  %v5434_v16 = vmov 0.0  }
  0x33   :  { %5094 = vmatprep.subr.bf16.mxu0 %v5432_v51  ;;  %v5107_v63 = vpack.c.bf16 %v723_v62, %v722_v61  ;;  %v5110_v3 = vpack.c.bf16 %v725_v1, %v724_v0  ;;  %v726_v4 = vld [vmem:[#allocation4 + $0xa0] sm:$0xff]  ;;  %v727_v5 = vld [vmem:[#allocation4 + $0xa8] sm:$0xff]  ;;  %v728_v10 = vld [vmem:[#allocation4 + $0xb0] sm:$0xff] }
  0x34   :  { %v5113_v8 = vpack.c.bf16 %v727_v5, %v726_v4  ;;  %v729_v11 = vld [vmem:[#allocation4 + $0xb8] sm:$0xff]  ;;  %v4126_v0 = vld [vmem:[#allocation4 + $0xc0] ss:$0 sm:$0xff] }
 0x100   :  { %v4523_v12 = vpop.f32.mrb[0].mxu0 }
 0x101   :  { %v142_v13 = vpop.f32.mrb[1].mxu0 }
 0x102   :  { %4531 = vmatprep.mubr.msk.f32.mxu1 %vm241_vm3, %v142_v13  ;;  %v5116_v13 = vpack.c.bf16 %v729_v11, %v728_v10 }
 0x103   :  { %4532 = vmatmul.mubr.msk.f32.vlgmr.msra.gmra.mrb[0].mxu1 %vm241_vm3, %v4523_v12 }
 0x104   :  { %4549 = vmatprep.mubr.msk.f32.mxu1 %vm69_vm0, %v5517_v24 }
 0x1d6   :  { %v4533_v18 = vpop.f32.mrb[0].mxu1 }
 0x1d7   :  { %v329_v19 = vadd.f32 %v4533_v18, %v4108_v17  ;;  %v314_v20 = vpop.f32.mrb[1].mxu1 }
 0x1d8   :  { %v328_v21 = vadd.f32 %v4108_v17, %v314_v20 }
 0x1d9   :  { %v5511_v23 = vmax.f32 %v329_v19, 0.0 }
 0x1da   :  { %v5509_v22 = vmax.f32 %v328_v21, 0.0 }
 0x1dc   :  { %4542 = vmatprep.mubr.msk.f32.mxu0 %vm341_vm4, %v5509_v22  ;;  %v5090_v33 = vpack.c.bf16 %v5511_v23, %v5509_v22 }
 0x1dd   :  { %4543 = vmatmul.mubr.msk.f32.vlgmr.msra.gmra.mrb[2].mxu0 %vm341_vm4, %v5511_v23 }
 0x1de   :  { %5096 = vmatpush3.bf16.msra.mxu0 %v5095_v52  ;;  %4606 = vmatprep.mubr.msk.f32.mxu0 %vm5433_vm5, %v5434_v16 }
 0x1df   :  { %5097 = vmatprep.subr.bf16.mxu0 %v5432_v51 }
 0x1e2   :  { %5099 = vmatpush3.bf16.msra.mxu0 %v5098_v54 }
 0x1e3   :  { %5100 = vmatprep.subr.bf16.mxu0 %v5432_v51 }
 0x1e6   :  { %5102 = vmatpush3.bf16.msra.mxu0 %v5101_v57 }
 0x1e7   :  { %5103 = vmatprep.subr.bf16.mxu0 %v5432_v51 }
 0x1ea   :  { %5105 = vmatpush3.bf16.msra.mxu0 %v5104_v60 }
 0x1eb   :  { %5106 = vmatprep.subr.bf16.mxu0 %v5432_v51 }
 0x1ee   :  { %5108 = vmatpush3.bf16.msra.mxu0 %v5107_v63 }
 0x1ef   :  { %5109 = vmatprep.subr.bf16.mxu0 %v5432_v51 }
 0x1f2   :  { %5111 = vmatpush3.bf16.msra.mxu0 %v5110_v3 }
 0x1f3   :  { %5112 = vmatprep.subr.bf16.mxu0 %v5432_v51 }
 0x1f6   :  { %5114 = vmatpush3.bf16.msra.mxu0 %v5113_v8 }
 0x1f7   :  { %5115 = vmatprep.subr.bf16.mxu0 %v5432_v51 }
 0x1fa   :  { %5117 = vmatpush3.bf16.msra.mxu0 %v5116_v13 }
 0x2b0   :  { %v4544_v26 = vpop.f32.mrb[2].mxu0 }
 0x2b1   :  { %v420_v27 = vadd.f32 %v4544_v26, %v4109_v25  ;;  %v414_v28 = vpop.f32.mrb[3].mxu0 }
 0x2b2   :  { %v415_v29 = vadd.f32 %v4109_v25, %v414_v28 }
 0x2b3   :  { %v424_v30 = vmax.f32 %v420_v27, 0.0 }
 0x2b4   :  { %v423_v31 = vmax.f32 %v415_v29, 0.0  ;;  %v64_v29 = vld [vmem:[#allocation2 + $0x98] sm:$0xff] }
 0x2b6   :  { %v5086_v32 = vpack.c.bf16 %v424_v30, %v423_v31  ;;  %v63_v30 = vld [vmem:[#allocation2 + $0x90] sm:$0xff] }
 0x2b8   :  { %5087 = vmatprep.subr.bf16.mxu1 %v5086_v32 }
 0x2b9   :  { %5089 = vmatpush3.bf16.msra.mxu1 %v5086_v32 }
 0x2ba   :  { %5091 = vmatprep.subr.bf16.mxu1 %v5090_v33 }
 0x2bc   :  { %4550 = vmatmul.mubr.msk.f32.vlgmr.msra.gmra.mrb[2].mxu1 %vm69_vm0, %v5523_v34 }
 0x2bd   :  { %5093 = vmatpush3.bf16.msra.mxu1 %v5090_v33  ;;  %4556 = vmatprep.mubr.msk.f32.mxu1 %vm69_vm0, %v5525_v35 }
 0x2be   :  { %5118 = vmatprep.subr.bf16.mxu1 %v5432_v51 }
 0x2c0   :  { %4557 = vmatmul.mubr.msk.f32.vlgmr.msra.gmra.mrb[4].mxu1 %vm69_vm0, %v5531_v36 }
 0x2c1   :  { %4559 = vmatprep.mubr.msk.f32.mxu1 %vm69_vm0, %v5533_v37 }
 0x2c4   :  { %4560 = vmatmul.mubr.msk.f32.gmra.mrb[6].mxu1 %vm69_vm0, %v5539_v38 }
 0x2c5   :  { %4562 = vmatprep.mubr.msk.f32.mxu1 %vm69_vm0, %v5541_v39 }
 0x2c8   :  { %4563 = vmatmul.mubr.msk.f32.gmra.mrb[8].mxu1 %vm69_vm0, %v5547_v40 }
 0x2c9   :  { %4565 = vmatprep.mubr.msk.f32.mxu1 %vm69_vm0, %v5549_v41 }
 0x2cc   :  { %4566 = vmatmul.mubr.msk.f32.gmra.mrb[10].mxu1 %vm69_vm0, %v5555_v42 }
 0x2cd   :  { %4568 = vmatprep.mubr.msk.f32.mxu1 %vm69_vm0, %v5557_v43 }
 0x2d0   :  { %4569 = vmatmul.mubr.msk.f32.gmra.mrb[12].mxu1 %vm69_vm0, %v5563_v44 }
 0x2d1   :  { %4571 = vmatprep.mubr.msk.f32.mxu1 %vm69_vm0, %v5565_v45 }
 0x2d4   :  { %4572 = vmatmul.mubr.msk.f32.gmra.mrb[14].mxu1 %vm69_vm0, %v5571_v46 }
 0x2d5   :  { %4621 = vmatprep.mubr.msk.f32.mxu1 %vm5433_vm5, %v5434_v16 }
 0x38f   :  { %v5583_v6 = vpop.f32.mrb[2].mxu1 }
 0x390   :  { %v5585_v9 = vpop.f32.mrb[3].mxu1 }
 0x393   :  { %v4558_v12 = vpop.f32.mrb[4].mxu1 }
 0x394   :  { %v608_v14 = vpop.f32.mrb[5].mxu1 }
 0x397   :  { %v4561_v15 = vpop.f32.mrb[6].mxu1 }
 0x398   :  { %670 = vrot.lane.b32.xlu0 %v4561_v15, %s5435_s0  ;;  %v618_v17 = vpop.f32.mrb[7].mxu1 }
 0x39b   :  { %v4564_v18 = vpop.f32.mrb[8].mxu1 }
 0x39c   :  { %v628_v19 = vpop.f32.mrb[9].mxu1 }
 0x39d   :  { %672 = vrot.lane.b32.xlu1 %v628_v19, %s5435_s0 }
 0x39f   :  { %v4567_v20 = vpop.f32.mrb[10].mxu1 }
 0x3a0   :  { %v638_v21 = vpop.f32.mrb[11].mxu1 }
 0x3a1   :  { %682 = vrot.lane.b32.xlu0 %v638_v21, %s5436_s1 }
 0x3a3   :  { %v4570_v25 = vpop.f32.mrb[12].mxu1 }
 0x3a4   :  { %694 = vrot.lane.b32.xlu1 %v4570_v25, %s5437_s21  ;;  %v648_v26 = vpop.f32.mrb[13].mxu1  ;;  %v894_v25 = vld [vmem:[#allocation4 + $0xd8] sm:$0xff] }
 0x3a5   :  { %684 = vrot.lane.b32.xlu0 %v4567_v20, %s5436_s1  ;;  %v5615_v20 = vld [vmem:[#allocation2 + $0xa8] sm:$0xff] }
 0x3a7   :  { %v4573_v27 = vpop.f32.mrb[14].mxu1 }
 0x3a8   :  { %v658_v28 = vpop.f32.mrb[15].mxu1 }
 0x3a9   :  { %674 = vrot.lane.b32.xlu0 %v4564_v18, %s5435_s0  ;;  %696 = vrot.lane.b32.xlu1 %v658_v28, %s5437_s21  ;;  %v893_v18 = vld [vmem:[#allocation4 + $0xd0] sm:$0xff] }
 0x3aa   :  { %v975_v28 = vld [vmem:[#allocation4 + $0xf0] sm:$0xff] }
 0x3ad   :  { %698 = vrot.lane.b32.xlu0 %v4573_v27, %s5437_s21  ;;  %686 = vrot.lane.b32.xlu1 %v648_v26, %s5436_s1  ;;  %v895_v26 = vld [vmem:[#allocation4 + $0xe0] sm:$0xff] }
 0x3ae   :  { %v5125_v27 = vpack.c.bf16 %v895_v26, %v894_v25  ;;  %v1325_v26 = vld [vmem:[#allocation4 + $0x128] sm:$0xff] }
 0x3b1   :  { %1064 = vperm.xlu0 %5359, %v64_v29   ;;  %1059 = vperm.xlu1 %5358, %v63_v30   ;;  %v976_v29 = vld [vmem:[#allocation4 + $0xf8] sm:$0xff] }
 0x3b2   :  { %v5128_v30 = vpack.c.bf16 %v976_v29, %v975_v28 }
 0x40a   :  { %v671_v31 = vpop.permute.xlu0 %670 }
 0x40b   :  { %v703_v47 = vsel %vm341_vm4, %v608_v14, %v671_v31 }
 0x40f   :  { %v673_v32 = vpop.permute.xlu1 %672 }
 0x410   :  { %v704_v53 = vsel %vm341_vm4, %v4558_v12, %v673_v32 }
 0x413   :  { %v683_v33 = vpop.permute.xlu0 %682 }
 0x414   :  { %v707_v48 = vsel %vm706_vm6, %v703_v47, %v683_v33  ;;  %v977_v33 = vld [vmem:[#allocation4 + $0x100] sm:$0xff]  ;;  %v978_v47 = vld [vmem:[#allocation4 + $0x108] sm:$0xff] }
 0x416   :  { %v695_v49 = vpop.permute.xlu1 %694 }
 0x417   :  { %v711_v50 = vsel %vm710_vm7, %v707_v48, %v695_v49  ;;  %v685_v52 = vpop.permute.xlu0 %684  ;;  %v5131_v48 = vpack.c.bf16 %v978_v47, %v977_v33  ;;  %v4128_v49 = vld [vmem:[#allocation4 + $0xe8] ss:$0 sm:$0xff] }
 0x418   :  { %4607 = vmatmul.mubr.f32.vlgmr.msra.gmra.mrb[4].mxu0 %v711_v50  ;;  %v708_v54 = vsel %vm706_vm6, %v704_v53, %v685_v52 }
 0x419   :  { %4609 = vmatprep.mubr.msk.f32.mxu0 %vm5433_vm5, %v5434_v16 }
 0x41b   :  { %v675_v55 = vpop.permute.xlu0 %674  ;;  %v697_v56 = vpop.permute.xlu1 %696 }
 0x41c   :  { %v712_v57 = vsel %vm710_vm7, %v708_v54, %v697_v56  ;;  %v705_v58 = vsel %vm341_vm4, %v618_v17, %v675_v55  ;;  %v892_v17 = vld [vmem:[#allocation4 + $0xc8] sm:$0xff]  ;;  %v5631_v55 = vld [vmem:[#allocation2 + $0x80] sm:$0xff] }
 0x41d   :  { %4610 = vmatmul.mubr.f32.gmra.mrb[6].mxu0 %v712_v57  ;;  %v5122_v21 = vpack.c.bf16 %v893_v18, %v892_v17  ;;  %v4130_v56 = vld [vmem:[#allocation4 + $0x110] ss:$0 sm:$0xff] }
 0x41e   :  { %4612 = vmatprep.mubr.msk.f32.mxu0 %vm5433_vm5, %v5434_v16 }
 0x41f   :  { %v699_v59 = vpop.permute.xlu0 %698  ;;  %v687_v60 = vpop.permute.xlu1 %686 }
 0x420   :  { %v709_v61 = vsel %vm706_vm6, %v705_v58, %v687_v60  ;;  %v5635_v60 = vld [vmem:[#allocation2 + $0x88] sm:$0xff] }
 0x421   :  { %v713_v62 = vsel %vm710_vm7, %v709_v61, %v699_v59  ;;  %v1229_v61 = vld [vmem:[#allocation4 + $0x418] sm:$0xff] }
 0x422   :  { %4613 = vmatmul.mubr.f32.gmra.mrb[8].mxu0 %v713_v62  ;;  %v1230_v62 = vld [vmem:[#allocation4 + $0x420] sm:$0xff] }
 0x423   :  { %4648 = vmatprep.mubr.msk.f32.mxu0 %vm241_vm3, %v5631_v55 }
 0x4eb   :  { %v801_v63 = vpop.f32.mrb[4].mxu0 }
 0x4ec   :  { %v4608_v1 = vpop.f32.mrb[5].mxu0  ;;  %v802_v3 = vadd.f32 %v4126_v0, %v801_v63  ;;  %v5137_v63 = vpack.c.bf16 %v1230_v62, %v1229_v61 }
 0x4ed   :  { %v5641_v1 = vpop.permute.xlu1 %1059 }
 0x4ee   :  { %v815_v10 = vmax.f32 %v802_v3, 0.0 }
 0x4f0   :  { %v806_v4 = vpop.f32.mrb[6].mxu0 }
 0x4f1   :  { %v807_v5 = vadd.f32 %v4126_v0, %v806_v4  ;;  %v4611_v8 = vpop.f32.mrb[7].mxu0 }
 0x4f3   :  { %v816_v11 = vmax.f32 %v807_v5, 0.0  ;;  %v1067_v5 = vmul.f32 %v5641_v1, %v5585_v9 }
 0x4f5   :  { %v5119_v12 = vpack.c.bf16 %v816_v11, %v815_v10  ;;  %v811_v13 = vpop.f32.mrb[8].mxu0 }
 0x4f6   :  { %v812_v14 = vadd.f32 %v4126_v0, %v811_v13  ;;  %v4614_v15 = vpop.f32.mrb[9].mxu0  ;;  %v5639_v0 = vpop.permute.xlu0 %1064  ;;  %v1231_v13 = vld [vmem:[#allocation4 + $0x428] sm:$0xff] }
 0x4f7   :  { %5120 = vmatpush3.bf16.msra.mxu1 %v5119_v12  ;;  %v1068_v3 = vmul.f32 %v5583_v6, %v5639_v0 }
 0x4f8   :  { %v817_v19 = vmax.f32 %v812_v14, 0.0  ;;  %4619 = vmatprep.subr.mxu1 %v5434_v16  ;;  %v1232_v14 = vld [vmem:[#allocation4 + $0x430] sm:$0xff] }
 0x4f9   :  { %v5141_v15 = vpack.c.bf16 %v1232_v14, %v1231_v13 }
 0x4fb   :  { %4620 = vmatpush3.msra.mxu1 %v817_v19  ;;  %v1323_v19 = vld [vmem:[#allocation4 + $0x118] sm:$0xff] }
 0x4fc   :  { %4622 = vmatmul.mubr.msk.f32.vlgmr.msra.gmra.mrb[16].mxu1 %vm818_vm8, %v5615_v20  ;;  %5121 = vmatprep.subr.bf16.mxu1 %v5432_v51 }
 0x4fd   :  { %5123 = vmatpush3.bf16.msra.mxu1 %v5122_v21  ;;  %4632 = vmatprep.mubr.msk.f32.mxu1 %vm5433_vm5, %v5434_v16  ;;  %v1324_v21 = vld [vmem:[#allocation4 + $0x120] sm:$0xff] }
 0x4fe   :  { %5124 = vmatprep.subr.bf16.mxu1 %v5432_v51  ;;  %v5145_v25 = vpack.c.bf16 %v1324_v21, %v1323_v19  ;;  %v1666_v19 = vld [vmem:[#allocation4 + $0x170] sm:$0xff]  ;;  %v1667_v21 = vld [vmem:[#allocation4 + $0x178] sm:$0xff] }
 0x501   :  { %5126 = vmatpush3.bf16.msra.mxu1 %v5125_v27  ;;  %v1326_v27 = vld [vmem:[#allocation4 + $0x130] sm:$0xff] }
 0x502   :  { %5127 = vmatprep.subr.bf16.mxu1 %v5432_v51  ;;  %v5149_v28 = vpack.c.bf16 %v1326_v27, %v1325_v26  ;;  %v5171_v26 = vpack.c.bf16 %v1667_v21, %v1666_v19 }
 0x5cf   :  { %v888_v31 = vpop.f32.mrb[16].mxu1 }
 0x5d0   :  { %v4623_v32 = vpop.f32.mrb[17].mxu1  ;;  %4633 = vmatmul.mubr.msk.f32.vlgmr.msra.gmra.mrb[18].mxu1 %vm341_vm4, %v888_v31 }
 0x5d1   :  { %5129 = vmatpush3.bf16.msra.mxu1 %v5128_v30  ;;  %4643 = vmatprep.mubr.msk.f32.mxu1 %vm5433_vm5, %v5434_v16 }
 0x5d2   :  { %5130 = vmatprep.subr.bf16.mxu1 %v5432_v51 }
 0x5d5   :  { %5132 = vmatpush3.bf16.msra.mxu1 %v5131_v48 }
 0x6a3   :  { %v970_v50 = vpop.f32.mrb[18].mxu1 }
 0x6a4   :  { %v971_v52 = vadd.f32 %v4128_v49, %v970_v50  ;;  %v4634_v53 = vpop.f32.mrb[19].mxu1  ;;  %v4139_v50 = vld [vmem:[#allocation4 + $0x138] ss:$0 sm:$0xff] }
 0x6a6   :  { %v974_v54 = vmax.f32 %v971_v52, 0.0 }
 0x6a8   :  { %4644 = vmatmul.mubr.msk.f32.vlgmr.msra.gmra.mrb[20].mxu1 %vm341_vm4, %v974_v54 }
 0x6a9   :  { %4655 = vmatprep.mubr.msk.f32.mxu1 %vm69_vm0, %v5493_v2 }
 0x77b   :  { %v1053_v57 = vpop.f32.mrb[20].mxu1 }
 0x77c   :  { %v1054_v58 = vadd.f32 %v4130_v56, %v1053_v57  ;;  %v4645_v59 = vpop.f32.mrb[21].mxu1 }
 0x77e   :  { %4646 = vmatprep.subr.mxu0 %v1054_v58 }
 0x77f   :  { %4647 = vmatpush3.msra.mxu0 %v1054_v58 }
 0x780   :  { %4649 = vmatmul.mubr.msk.f32.vlgmr.msra.gmra.mrb[10].mxu0 %vm241_vm3, %v5635_v60  ;;  %5138 = vmatprep.subr.bf16.mxu0 %v5137_v63 }
 0x781   :  { %5140 = vmatpush3.bf16.msra.mxu0 %v5137_v63  ;;  %v1660_v63 = vld [vmem:[#allocation4 + $0x140] sm:$0xff] }
 0x782   :  { %5142 = vmatprep.subr.bf16.mxu0 %v5141_v15 }
 0x785   :  { %5144 = vmatpush3.bf16.msra.mxu0 %v5141_v15  ;;  %v1664_v15 = vld [vmem:[#allocation4 + $0x160] sm:$0xff] }
 0x853   :  { %v4650_v4 = vpop.f32.mrb[10].mxu0 }
 0x854   :  { %v1151_v8 = vadd.f32 %v4650_v4, %v1068_v3  ;;  %v1141_v10 = vpop.f32.mrb[11].mxu0  ;;  %v1661_v3 = vld [vmem:[#allocation4 + $0x148] sm:$0xff] }
 0x855   :  { %v1150_v11 = vadd.f32 %v1141_v10, %v1067_v5  ;;  %v5162_v5 = vpack.c.bf16 %v1661_v3, %v1660_v63  ;;  %v1662_v10 = vld [vmem:[#allocation4 + $0x150] sm:$0xff] }
 0x857   :  { %v5133_v12 = vpack.c.bf16 %v1151_v8, %v1150_v11  ;;  %v1663_v11 = vld [vmem:[#allocation4 + $0x158] sm:$0xff] }
 0x858   :  { %v5165_v13 = vpack.c.bf16 %v1663_v11, %v1662_v10 }
 0x859   :  { %5134 = vmatprep.subr.bf16.mxu1 %v5133_v12 }
 0x85a   :  { %5136 = vmatpush3.bf16.msra.mxu1 %v5133_v12 }
 0x85b   :  { %5146 = vmatprep.subr.bf16.mxu1 %v5145_v25 }
 0x85d   :  { %4656 = vmatmul.mubr.msk.f32.vlgmr.msra.gmra.mrb[22].mxu1 %vm69_vm0, %v5503_v7 }
 0x85e   :  { %5148 = vmatpush3.bf16.msra.mxu1 %v5145_v25 }
 0x85f   :  { %5150 = vmatprep.subr.bf16.mxu1 %v5149_v28 }
 0x862   :  { %5152 = vmatpush3.bf16.msra.mxu1 %v5149_v28  ;;  %v1668_v28 = vld [vmem:[#allocation4 + $0x180] sm:$0xff] }
 0x930   :  { %v4657_v17 = vpop.f32.mrb[22].mxu1 }
 0x931   :  { %v1218_v6 = vpop.f32.mrb[23].mxu1  ;;  %v1228_v9 = vsub.f32 %v4657_v17, %v5509_v22  ;;  %v1665_v17 = vld [vmem:[#allocation4 + $0x168] sm:$0xff] }
 0x932   :  { %v1227_v18 = vsub.f32 %v1218_v6, %v5511_v23  ;;  %v4136_v23 = vld [vmem:[#allocation4 + $0x438] ss:$0 sm:$0xff] }
 0x934   :  { %4666 = vmatprep.mubr.msk.f32.mxu0 %vm341_vm4, %v1227_v18  ;;  %v5168_v18 = vpack.c.bf16 %v1665_v17, %v1664_v15 }
 0x935   :  { %4667 = vmatmul.mubr.msk.f32.vlgmr.msra.gmra.mrb[12].mxu0 %vm341_vm4, %v1228_v9 }
 0x936   :  { %4684 = vmatprep.mubr.msk.f32.mxu0 %vm69_vm0, %v5517_v24 }
 0xa08   :  { %v4668_v29 = vpop.f32.mrb[12].mxu0 }
 0xa09   :  { %v1316_v22 = vadd.f32 %v4668_v29, %v4136_v23  ;;  %v1310_v30 = vpop.f32.mrb[13].mxu0 }
 0xa0a   :  { %v1311_v31 = vadd.f32 %v4136_v23, %v1310_v30  ;;  %v1669_v23 = vld [vmem:[#allocation4 + $0x188] sm:$0xff] }
 0xa0b   :  { %v1320_v32 = vmax.f32 %v1316_v22, 0.0  ;;  %v5174_v22 = vpack.c.bf16 %v1669_v23, %v1668_v28 }
 0xa0c   :  { %v1319_v33 = vmax.f32 %v1311_v31, 0.0  ;;  %v1670_v31 = vld [vmem:[#allocation4 + $0x190] sm:$0xff] }
 0xa0d   :  { %v5655_v47 = vmul.f32 2.0, %v1320_v32  ;;  %v1671_v32 = vld [vmem:[#allocation4 + $0x198] sm:$0xff] }
 0xa0e   :  { %v5657_v48 = vmul.f32 2.0, %v1319_v33  ;;  %v5177_v33 = vpack.c.bf16 %v1671_v32, %v1670_v31  ;;  %v1834_v32 = vld [vmem:[#allocation4 + $0x1c8] sm:$0xff] }
 0xa10   :  { %4677 = vmatprep.mubr.msk.f32.mxu1 %vm341_vm4, %v5657_v48  ;;  %v5157_v49 = vpack.c.bf16 %v5655_v47, %v5657_v48 }
 0xa11   :  { %4678 = vmatmul.mubr.msk.f32.vlgmr.msra.gmra.mrb[24].mxu1 %vm341_vm4, %v5655_v47 }
 0xa12   :  { %5158 = vmatprep.subr.bf16.mxu1 %v5157_v49  ;;  %4691 = vmatprep.mubr.msk.f32.mxu1 %vm69_vm0, %v5525_v35 }
 0xa13   :  { %5160 = vmatpush3.bf16.msra.mxu1 %v5157_v49  ;;  %v1672_v49 = vld [vmem:[#allocation4 + $0x1a0] sm:$0xff] }
 0xa14   :  { %5185 = vmatprep.subr.bf16.mxu1 %v5432_v51 }
 0xa16   :  { %4692 = vmatmul.mubr.msk.f32.vlgmr.msra.gmra.mrb[26].mxu1 %vm69_vm0, %v5531_v36 }
 0xa17   :  { %4694 = vmatprep.mubr.msk.f32.mxu1 %vm69_vm0, %v5533_v37 }
 0xa1a   :  { %4695 = vmatmul.mubr.msk.f32.gmra.mrb[28].mxu1 %vm69_vm0, %v5539_v38 }
 0xa1b   :  { %4697 = vmatprep.mubr.msk.f32.mxu1 %vm69_vm0, %v5541_v39 }
 0xa1e   :  { %4698 = vmatmul.mubr.msk.f32.gmra.mrb[30].mxu1 %vm69_vm0, %v5547_v40 }
 0xa1f   :  { %4700 = vmatprep.mubr.msk.f32.mxu1 %vm69_vm0, %v5549_v41 }
 0xa22   :  { %4701 = vmatmul.mubr.msk.f32.gmra.mrb[32].mxu1 %vm69_vm0, %v5555_v42 }
 0xa23   :  { %4703 = vmatprep.mubr.msk.f32.mxu1 %vm69_vm0, %v5557_v43 }
 0xa26   :  { %4704 = vmatmul.mubr.msk.f32.gmra.mrb[34].mxu1 %vm69_vm0, %v5563_v44 }
 0xa27   :  { %4706 = vmatprep.mubr.msk.f32.mxu1 %vm69_vm0, %v5565_v45 }
 0xa2a   :  { %4707 = vmatmul.mubr.msk.f32.gmra.mrb[36].mxu1 %vm69_vm0, %v5571_v46 }
 0xa2b   :  { %4756 = vmatprep.mubr.msk.f32.mxu1 %vm5433_vm5, %v5434_v16 }
 0xae4   :  { %v4679_v52 = vpop.f32.mrb[24].mxu1 }
 0xae5   :  { %v1410_v53 = vadd.f32 %v4679_v52, %v4139_v50  ;;  %v1404_v54 = vpop.f32.mrb[25].mxu1 }
 0xae6   :  { %v1405_v56 = vadd.f32 %v4139_v50, %v1404_v54  ;;  %v1673_v50 = vld [vmem:[#allocation4 + $0x1a8] sm:$0xff]  ;;  %v1675_v54 = vld [vmem:[#allocation4 + $0x1b8] sm:$0xff] }
 0xae7   :  { %v1414_v57 = vmax.f32 %v1410_v53, 0.0  ;;  %v5180_v52 = vpack.c.bf16 %v1673_v50, %v1672_v49  ;;  %v1674_v53 = vld [vmem:[#allocation4 + $0x1b0] sm:$0xff] }
 0xae8   :  { %v1413_v58 = vmax.f32 %v1405_v56, 0.0  ;;  %v5183_v56 = vpack.c.bf16 %v1675_v54, %v1674_v53  ;;  %v1836_v54 = vld [vmem:[#allocation4 + $0x1d8] sm:$0xff] }
 0xae9   :  { %v5692_v59 = vpop.f32.mrb[26].mxu1 }
 0xaea   :  { %v5153_v61 = vpack.c.bf16 %v1414_v57, %v1413_v58  ;;  %v5694_v62 = vpop.f32.mrb[27].mxu1 }
 0xaec   :  { %5154 = vmatprep.subr.bf16.mxu0 %v5153_v61 }
 0xaed   :  { %5156 = vmatpush3.bf16.msra.mxu0 %v5153_v61  ;;  %v4696_v4 = vpop.f32.mrb[28].mxu1 }
 0xaee   :  { %1618 = vrot.lane.b32.xlu1 %v4696_v4, %s5435_s0  ;;  %v5697_v8 = vpop.f32.mrb[29].mxu1  ;;  %5161 = vmatprep.subr.bf16.mxu0 %v5432_v51 }
 0xaf0   :  { %4685 = vmatmul.mubr.msk.f32.vlgmr.msra.gmra.mrb[14].mxu0 %vm69_vm0, %v5523_v34 }
 0xaf1   :  { %v4699_v12 = vpop.f32.mrb[30].mxu1  ;;  %5163 = vmatpush3.bf16.msra.mxu0 %v5162_v5  ;;  %4741 = vmatprep.mubr.msk.f32.mxu0 %vm5433_vm5, %v5434_v16 }
 0xaf2   :  { %v1576_v14 = vpop.f32.mrb[31].mxu1  ;;  %5164 = vmatprep.subr.bf16.mxu0 %v5432_v51 }
 0xaf5   :  { %v4702_v6 = vpop.f32.mrb[32].mxu1  ;;  %5166 = vmatpush3.bf16.msra.mxu0 %v5165_v13 }
 0xaf6   :  { %v1586_v9 = vpop.f32.mrb[33].mxu1  ;;  %5167 = vmatprep.subr.bf16.mxu0 %v5432_v51 }
 0xaf7   :  { %1630 = vrot.lane.b32.xlu1 %v1586_v9, %s5436_s1 }
 0xaf9   :  { %v4705_v25 = vpop.f32.mrb[34].mxu1  ;;  %5169 = vmatpush3.bf16.msra.mxu0 %v5168_v18 }
 0xafa   :  { %1642 = vrot.lane.b32.xlu0 %v4705_v25, %s5437_s21  ;;  %v1596_v27 = vpop.f32.mrb[35].mxu1  ;;  %5170 = vmatprep.subr.bf16.mxu0 %v5432_v51  ;;  %v4156_v25 = vld [vmem:[#allocation4 + $0x1c0] ss:$0 sm:$0xff] }
 0xafb   :  { %1620 = vrot.lane.b32.xlu1 %v1576_v14, %s5435_s0 }
 0xafd   :  { %v4708_v29 = vpop.f32.mrb[36].mxu1  ;;  %5172 = vmatpush3.bf16.msra.mxu0 %v5171_v26 }
 0xafe   :  { %1632 = vrot.lane.b32.xlu0 %v4702_v6, %s5436_s1  ;;  %v1606_v30 = vpop.f32.mrb[37].mxu1  ;;  %5173 = vmatprep.subr.bf16.mxu0 %v5432_v51 }
 0xaff   :  { %1644 = vrot.lane.b32.xlu1 %v1606_v30, %s5437_s21 }
 0xb01   :  { %5175 = vmatpush3.bf16.msra.mxu0 %v5174_v22 }
 0xb02   :  { %1622 = vrot.lane.b32.xlu0 %v4699_v12, %s5435_s0  ;;  %5176 = vmatprep.subr.bf16.mxu0 %v5432_v51 }
 0xb03   :  { %1634 = vrot.lane.b32.xlu1 %v1596_v27, %s5436_s1 }
 0xb05   :  { %5178 = vmatpush3.bf16.msra.mxu0 %v5177_v33  ;;  %v1835_v33 = vld [vmem:[#allocation4 + $0x1d0] sm:$0xff] }
 0xb06   :  { %1646 = vrot.lane.b32.xlu0 %v4708_v29, %s5437_s21  ;;  %5179 = vmatprep.subr.bf16.mxu0 %v5432_v51  ;;  %v5189_v53 = vpack.c.bf16 %v1835_v33, %v1834_v32 }
 0xb09   :  { %5181 = vmatpush3.bf16.msra.mxu0 %v5180_v52 }
 0xb0a   :  { %5182 = vmatprep.subr.bf16.mxu0 %v5432_v51 }
 0xb0d   :  { %5184 = vmatpush3.bf16.msra.mxu0 %v5183_v56  ;;  %v1837_v56 = vld [vmem:[#allocation4 + $0x1e0] sm:$0xff] }
 0xb60   :  { %v1619_v57 = vpop.permute.xlu1 %1618 }
 0xb61   :  { %v1651_v61 = vsel %vm341_vm4, %v5694_v62, %v1619_v57  ;;  %v5192_v57 = vpack.c.bf16 %v1837_v56, %v1836_v54  ;;  %v2252_v54 = vld [vmem:[#allocation4 + $0x230] sm:$0xff] }
 0xb69   :  { %v1631_v58 = vpop.permute.xlu1 %1630 }
 0xb6a   :  { %v1654_v63 = vsel %vm706_vm6, %v1651_v61, %v1631_v58  ;;  %v1917_v58 = vld [vmem:[#allocation4 + $0x1f0] sm:$0xff]  ;;  %v1918_v61 = vld [vmem:[#allocation4 + $0x1f8] sm:$0xff] }
 0xb6c   :  { %v1643_v3 = vpop.permute.xlu0 %1642 }
 0xb6d   :  { %v1657_v4 = vsel %vm710_vm7, %v1654_v63, %v1643_v3  ;;  %v1621_v5 = vpop.permute.xlu1 %1620  ;;  %v5195_v63 = vpack.c.bf16 %v1918_v61, %v1917_v58 }
 0xb6e   :  { %4742 = vmatmul.mubr.f32.vlgmr.msra.gmra.mrb[16].mxu0 %v1657_v4  ;;  %v1652_v10 = vsel %vm341_vm4, %v5692_v59, %v1621_v5  ;;  %v1919_v5 = vld [vmem:[#allocation4 + $0x200] sm:$0xff] }
 0xb6f   :  { %4744 = vmatprep.mubr.msk.f32.mxu0 %vm5433_vm5, %v5434_v16 }
 0xb70   :  { %v1633_v11 = vpop.permute.xlu0 %1632 }
 0xb71   :  { %v1655_v12 = vsel %vm706_vm6, %v1652_v10, %v1633_v11  ;;  %v1645_v13 = vpop.permute.xlu1 %1644  ;;  %v1920_v10 = vld [vmem:[#allocation4 + $0x208] sm:$0xff] }
 0xb72   :  { %v1658_v14 = vsel %vm710_vm7, %v1655_v12, %v1645_v13  ;;  %v5198_v11 = vpack.c.bf16 %v1920_v10, %v1919_v5  ;;  %v4158_v12 = vld [vmem:[#allocation4 + $0x1e8] ss:$0 sm:$0xff]  ;;  %v2586_v10 = vld [vmem:[#allocation4 + $0x240] sm:$0xff] }
 0xb73   :  { %4745 = vmatmul.mubr.f32.gmra.mrb[18].mxu0 %v1658_v14 }
 0xb74   :  { %v1623_v62 = vpop.permute.xlu0 %1622  ;;  %4747 = vmatprep.mubr.msk.f32.mxu0 %vm5433_vm5, %v5434_v16 }
 0xb75   :  { %v1653_v15 = vsel %vm341_vm4, %v5697_v8, %v1623_v62  ;;  %v1635_v17 = vpop.permute.xlu1 %1634 }
 0xb76   :  { %v1656_v6 = vsel %vm706_vm6, %v1653_v15, %v1635_v17  ;;  %v4160_v17 = vld [vmem:[#allocation4 + $0x210] ss:$0 sm:$0xff] }
 0xb78   :  { %v1647_v18 = vpop.permute.xlu0 %1646 }
 0xb79   :  { %v1659_v59 = vsel %vm710_vm7, %v1656_v6, %v1647_v18 }
 0xb7a   :  { %4748 = vmatmul.mubr.f32.gmra.mrb[20].mxu0 %v1659_v59 }
 0xb7b   :  { %4783 = vmatprep.mubr.msk.f32.mxu0 %vm241_vm3, %v5631_v55 }
 0xbc3   :  { %v5737_v9 = vpop.f32.mrb[14].mxu0 }
 0xbc4   :  { %v5739_v19 = vpop.f32.mrb[15].mxu0 }
 0xc41   :  { %v1747_v21 = vpop.f32.mrb[16].mxu0 }
 0xc42   :  { %v4743_v26 = vpop.f32.mrb[17].mxu0  ;;  %v1748_v27 = vadd.f32 %v4156_v25, %v1747_v21  ;;  %v2155_v21 = vld [vmem:[#allocation4 + $0x440] sm:$0xff] }
 0xc44   :  { %v1761_v29 = vmax.f32 %v1748_v27, 0.0  ;;  %v2000_v27 = vmul.f32 %v5737_v9, %v5639_v0 }
 0xc46   :  { %v1752_v28 = vpop.f32.mrb[18].mxu0 }
 0xc47   :  { %v1753_v8 = vadd.f32 %v4156_v25, %v1752_v28  ;;  %v4746_v23 = vpop.f32.mrb[19].mxu0 }
 0xc49   :  { %v1762_v22 = vmax.f32 %v1753_v8, 0.0 }
 0xc4b   :  { %v5186_v30 = vpack.c.bf16 %v1762_v22, %v1761_v29 }
 0xc4d   :  { %v1757_v31 = vpop.f32.mrb[20].mxu0  ;;  %5187 = vmatpush3.bf16.msra.mxu1 %v5186_v30  ;;  %v2157_v30 = vld [vmem:[#allocation4 + $0x450] sm:$0xff] }
 0xc4e   :  { %v1758_v49 = vadd.f32 %v4156_v25, %v1757_v31  ;;  %v4749_v50 = vpop.f32.mrb[21].mxu0  ;;  %4754 = vmatprep.subr.mxu1 %v5434_v16  ;;  %v2156_v25 = vld [vmem:[#allocation4 + $0x448] sm:$0xff]  ;;  %v2158_v31 = vld [vmem:[#allocation4 + $0x458] sm:$0xff] }
 0xc4f   :  { %v5204_v26 = vpack.c.bf16 %v2156_v25, %v2155_v21  ;;  %v5208_v32 = vpack.c.bf16 %v2158_v31, %v2157_v30  ;;  %v2249_v50 = vld [vmem:[#allocation4 + $0x218] sm:$0xff]  ;;  %v2596_v31 = vld [vmem:[#allocation4 + $0x290] sm:$0xff] }
 0xc50   :  { %v1763_v52 = vmax.f32 %v1758_v49, 0.0 }
 0xc52   :  { %4755 = vmatpush3.msra.mxu1 %v1763_v52 }
 0xc53   :  { %4757 = vmatmul.mubr.msk.f32.vlgmr.msra.gmra.mrb[38].mxu1 %vm818_vm8, %v5615_v20  ;;  %5188 = vmatprep.subr.bf16.mxu1 %v5432_v51 }
 0xc54   :  { %5190 = vmatpush3.bf16.msra.mxu1 %v5189_v53  ;;  %4767 = vmatprep.mubr.msk.f32.mxu1 %vm5433_vm5, %v5434_v16  ;;  %v2251_v53 = vld [vmem:[#allocation4 + $0x228] sm:$0xff] }
 0xc55   :  { %5191 = vmatprep.subr.bf16.mxu1 %v5432_v51  ;;  %v5216_v56 = vpack.c.bf16 %v2252_v54, %v2251_v53 }
 0xc58   :  { %5193 = vmatpush3.bf16.msra.mxu1 %v5192_v57 }
 0xc59   :  { %5194 = vmatprep.subr.bf16.mxu1 %v5432_v51 }
 0xd26   :  { %v1830_v3 = vpop.f32.mrb[38].mxu1 }
 0xd27   :  { %v4758_v4 = vpop.f32.mrb[39].mxu1  ;;  %4768 = vmatmul.mubr.msk.f32.vlgmr.msra.gmra.mrb[40].mxu1 %vm341_vm4, %v1830_v3 }
 0xd28   :  { %5196 = vmatpush3.bf16.msra.mxu1 %v5195_v63  ;;  %4778 = vmatprep.mubr.msk.f32.mxu1 %vm5433_vm5, %v5434_v16 }
 0xd29   :  { %5197 = vmatprep.subr.bf16.mxu1 %v5432_v51 }
 0xd2c   :  { %5199 = vmatpush3.bf16.msra.mxu1 %v5198_v11 }
 0xdfa   :  { %v1912_v13 = vpop.f32.mrb[40].mxu1 }
 0xdfb   :  { %v1913_v14 = vadd.f32 %v4158_v12, %v1912_v13  ;;  %v4769_v62 = vpop.f32.mrb[41].mxu1  ;;  %v2588_v13 = vld [vmem:[#allocation4 + $0x250] sm:$0xff] }
 0xdfd   :  { %v1916_v15 = vmax.f32 %v1913_v14, 0.0  ;;  %v2589_v14 = vld [vmem:[#allocation4 + $0x258] sm:$0xff] }
 0xdff   :  { %4779 = vmatmul.mubr.msk.f32.vlgmr.msra.gmra.mrb[42].mxu1 %vm341_vm4, %v1916_v15  ;;  %v5232_v15 = vpack.c.bf16 %v2589_v14, %v2588_v13 }
 0xe00   :  { %4790 = vmatprep.mubr.msk.f32.mxu1 %vm69_vm0, %v5493_v2  ;;  %v1999_v2 = vmul.f32 %v5739_v19, %v5641_v1 }
 0xed2   :  { %v1995_v6 = vpop.f32.mrb[42].mxu1 }
 0xed3   :  { %v1996_v18 = vadd.f32 %v4160_v17, %v1995_v6  ;;  %v4780_v59 = vpop.f32.mrb[43].mxu1  ;;  %v2590_v6 = vld [vmem:[#allocation4 + $0x260] sm:$0xff] }
 0xed5   :  { %4781 = vmatprep.subr.mxu0 %v1996_v18 }
 0xed6   :  { %4782 = vmatpush3.msra.mxu0 %v1996_v18  ;;  %v2591_v18 = vld [vmem:[#allocation4 + $0x268] sm:$0xff] }
 0xed7   :  { %4784 = vmatmul.mubr.msk.f32.vlgmr.msra.gmra.mrb[22].mxu0 %vm241_vm3, %v5635_v60  ;;  %5205 = vmatprep.subr.bf16.mxu0 %v5204_v26  ;;  %v5235_v21 = vpack.c.bf16 %v2591_v18, %v2590_v6  ;;  %v2760_v6 = vld [vmem:[#allocation4 + $0x2c8] sm:$0xff]  ;;  %v2761_v18 = vld [vmem:[#allocation4 + $0x2d0] sm:$0xff] }
 0xed8   :  { %5207 = vmatpush3.bf16.msra.mxu0 %v5204_v26  ;;  %v2592_v26 = vld [vmem:[#allocation4 + $0x270] sm:$0xff] }
 0xed9   :  { %5209 = vmatprep.subr.bf16.mxu0 %v5208_v32 }
 0xedc   :  { %5211 = vmatpush3.bf16.msra.mxu0 %v5208_v32  ;;  %v2597_v32 = vld [vmem:[#allocation4 + $0x298] sm:$0xff] }
 0xfaa   :  { %v4785_v28 = vpop.f32.mrb[22].mxu0 }
 0xfab   :  { %v2077_v8 = vadd.f32 %v4785_v28, %v2000_v27  ;;  %v2067_v23 = vpop.f32.mrb[23].mxu0  ;;  %v2593_v27 = vld [vmem:[#allocation4 + $0x278] sm:$0xff] }
 0xfac   :  { %v2076_v29 = vadd.f32 %v2067_v23, %v1999_v2  ;;  %v5238_v2 = vpack.c.bf16 %v2593_v27, %v2592_v26  ;;  %v2595_v23 = vld [vmem:[#allocation4 + $0x288] sm:$0xff]  ;;  %v2762_v26 = vld [vmem:[#allocation4 + $0x2d8] sm:$0xff]  ;;  %v2763_v27 = vld [vmem:[#allocation4 + $0x2e0] sm:$0xff] }
 0xfae   :  { %v5200_v22 = vpack.c.bf16 %v2077_v8, %v2076_v29  ;;  %v2594_v8 = vld [vmem:[#allocation4 + $0x280] sm:$0xff] }
 0xfb0   :  { %5201 = vmatprep.subr.bf16.mxu1 %v5200_v22 }
 0xfb1   :  { %5203 = vmatpush3.bf16.msra.mxu1 %v5200_v22  ;;  %v5241_v22 = vpack.c.bf16 %v2595_v23, %v2594_v8 }
 0xfb4   :  { %4791 = vmatmul.mubr.msk.f32.vlgmr.msra.gmra.mrb[44].mxu1 %vm69_vm0, %v5503_v7  ;;  %v2250_v7 = vld [vmem:[#allocation4 + $0x220] sm:$0xff] }
 0xfb5   :  { %v5212_v52 = vpack.c.bf16 %v2250_v7, %v2249_v50  ;;  %v2600_v50 = vld [vmem:[#allocation4 + $0x2b0] sm:$0xff]  ;;  %v2601_v7 = vld [vmem:[#allocation4 + $0x2b8] sm:$0xff] }
 0xfb7   :  { %5213 = vmatprep.subr.bf16.mxu1 %v5212_v52 }
 0xfb8   :  { %5215 = vmatpush3.bf16.msra.mxu1 %v5212_v52  ;;  %v5250_v52 = vpack.c.bf16 %v2601_v7, %v2600_v50  ;;  %v4190_v50 = vld [vmem:[#allocation4 + $0x310] ss:$0 sm:$0xff] }
 0xfb9   :  { %5217 = vmatprep.subr.bf16.mxu1 %v5216_v56 }
 0xfbc   :  { %5219 = vmatpush3.bf16.msra.mxu1 %v5216_v56 }
0x1087   :  { %v4792_v33 = vpop.f32.mrb[44].mxu1 }
0x1088   :  { %v2144_v9 = vpop.f32.mrb[45].mxu1  ;;  %v2154_v19 = vsub.f32 %v4792_v33, %v5657_v48  ;;  %v5244_v33 = vpack.c.bf16 %v2597_v32, %v2596_v31  ;;  %v4188_v31 = vld [vmem:[#allocation4 + $0x2e8] ss:$0 sm:$0xff] }
0x1089   :  { %v2153_v49 = vsub.f32 %v2144_v9, %v5655_v47  ;;  %v4166_v47 = vld [vmem:[#allocation4 + $0x460] ss:$0 sm:$0xff] }
0x108a   :  { %v2598_v9 = vld [vmem:[#allocation4 + $0x2a0] sm:$0xff] }
0x108b   :  { %4801 = vmatprep.mubr.msk.f32.mxu0 %vm341_vm4, %v2153_v49  ;;  %v2599_v49 = vld [vmem:[#allocation4 + $0x2a8] sm:$0xff] }
0x108c   :  { %4802 = vmatmul.mubr.msk.f32.vlgmr.msra.gmra.mrb[24].mxu0 %vm341_vm4, %v2154_v19  ;;  %v5247_v19 = vpack.c.bf16 %v2599_v49, %v2598_v9 }
0x108d   :  { %4819 = vmatprep.mubr.msk.f32.mxu0 %vm69_vm0, %v5517_v24 }
0x115f   :  { %v4803_v57 = vpop.f32.mrb[24].mxu0 }
0x1160   :  { %v2242_v48 = vadd.f32 %v4803_v57, %v4166_v47  ;;  %v2236_v58 = vpop.f32.mrb[25].mxu0 }
0x1161   :  { %v2237_v61 = vadd.f32 %v4166_v47, %v2236_v58 }
0x1162   :  { %v2246_v63 = vmax.f32 %v2242_v48, 0.0 }
0x1163   :  { %v2245_v3 = vmax.f32 %v2237_v61, 0.0 }
0x1164   :  { %v5770_v4 = vmul.f32 2.0, %v2246_v63 }
0x1165   :  { %v5772_v24 = vmul.f32 2.0, %v2245_v3 }
0x1167   :  { %4812 = vmatprep.mubr.msk.f32.mxu1 %vm341_vm4, %v5772_v24  ;;  %v5224_v5 = vpack.c.bf16 %v5770_v4, %v5772_v24 }
0x1168   :  { %4813 = vmatmul.mubr.msk.f32.vlgmr.msra.gmra.mrb[46].mxu1 %vm341_vm4, %v5770_v4 }
0x1169   :  { %5225 = vmatprep.subr.bf16.mxu1 %v5224_v5  ;;  %4826 = vmatprep.mubr.msk.f32.mxu1 %vm69_vm0, %v5525_v35  ;;  %v4169_v35 = vld [vmem:[#allocation4 + $0x238] ss:$0 sm:$0xff] }
0x116a   :  { %5227 = vmatpush3.bf16.msra.mxu1 %v5224_v5 }
0x116b   :  { %5252 = vmatprep.subr.bf16.mxu1 %v5432_v51 }
0x116d   :  { %4827 = vmatmul.mubr.msk.f32.vlgmr.msra.gmra.mrb[48].mxu1 %vm69_vm0, %v5531_v36 }
0x116e   :  { %4829 = vmatprep.mubr.msk.f32.mxu1 %vm69_vm0, %v5533_v37 }
0x1171   :  { %4830 = vmatmul.mubr.msk.f32.gmra.mrb[50].mxu1 %vm69_vm0, %v5539_v38 }
0x1172   :  { %4832 = vmatprep.mubr.msk.f32.mxu1 %vm69_vm0, %v5541_v39 }
0x1175   :  { %4833 = vmatmul.mubr.msk.f32.gmra.mrb[52].mxu1 %vm69_vm0, %v5547_v40 }
0x1176   :  { %4835 = vmatprep.mubr.msk.f32.mxu1 %vm69_vm0, %v5549_v41 }
0x1179   :  { %4836 = vmatmul.mubr.msk.f32.gmra.mrb[54].mxu1 %vm69_vm0, %v5555_v42 }
0x117a   :  { %4838 = vmatprep.mubr.msk.f32.mxu1 %vm69_vm0, %v5557_v43 }
0x117d   :  { %4839 = vmatmul.mubr.msk.f32.gmra.mrb[56].mxu1 %vm69_vm0, %v5563_v44 }
0x117e   :  { %4841 = vmatprep.mubr.msk.f32.mxu1 %vm69_vm0, %v5565_v45  ;;  %v2587_v45 = vld [vmem:[#allocation4 + $0x248] sm:$0xff] }
0x117f   :  { %v5229_v11 = vpack.c.bf16 %v2587_v45, %v2586_v10  ;;  %v4186_v10 = vld [vmem:[#allocation4 + $0x2c0] ss:$0 sm:$0xff] }
0x1181   :  { %4842 = vmatmul.mubr.msk.f32.gmra.mrb[58].mxu1 %vm69_vm0, %v5571_v46 }
0x1182   :  { %4891 = vmatprep.mubr.msk.f32.mxu1 %vm5433_vm5, %v5434_v16 }
0x123b   :  { %v4814_v36 = vpop.f32.mrb[46].mxu1 }
0x123c   :  { %v2336_v37 = vadd.f32 %v4814_v36, %v4169_v35  ;;  %v2330_v38 = vpop.f32.mrb[47].mxu1 }
0x123d   :  { %v2331_v39 = vadd.f32 %v4169_v35, %v2330_v38 }
0x123e   :  { %v2340_v40 = vmax.f32 %v2336_v37, 0.0 }
0x123f   :  { %v2339_v41 = vmax.f32 %v2331_v39, 0.0 }
0x1240   :  { %v5807_v42 = vpop.f32.mrb[48].mxu1 }
0x1241   :  { %v5220_v43 = vpack.c.bf16 %v2340_v40, %v2339_v41  ;;  %v5809_v44 = vpop.f32.mrb[49].mxu1 }
0x1243   :  { %5221 = vmatprep.subr.bf16.mxu0 %v5220_v43 }
0x1244   :  { %5223 = vmatpush3.bf16.msra.mxu0 %v5220_v43  ;;  %v4831_v46 = vpop.f32.mrb[50].mxu1 }
0x1245   :  { %2544 = vrot.lane.b32.xlu1 %v4831_v46, %s5435_s0  ;;  %v5812_v12 = vpop.f32.mrb[51].mxu1  ;;  %5228 = vmatprep.subr.bf16.mxu0 %v5432_v51 }
0x1247   :  { %4820 = vmatmul.mubr.msk.f32.vlgmr.msra.gmra.mrb[26].mxu0 %vm69_vm0, %v5523_v34 }
0x1248   :  { %v4834_v62 = vpop.f32.mrb[52].mxu1  ;;  %5230 = vmatpush3.bf16.msra.mxu0 %v5229_v11  ;;  %4876 = vmatprep.mubr.msk.f32.mxu0 %vm5433_vm5, %v5434_v16 }
0x1249   :  { %v2502_v17 = vpop.f32.mrb[53].mxu1  ;;  %5231 = vmatprep.subr.bf16.mxu0 %v5432_v51 }
0x124c   :  { %v4837_v59 = vpop.f32.mrb[54].mxu1  ;;  %5233 = vmatpush3.bf16.msra.mxu0 %v5232_v15 }
0x124d   :  { %v2512_v25 = vpop.f32.mrb[55].mxu1  ;;  %5234 = vmatprep.subr.bf16.mxu0 %v5432_v51 }
0x124e   :  { %2556 = vrot.lane.b32.xlu0 %v2512_v25, %s5436_s1  ;;  %v5256_v25 = vpack.c.bf16 %v2761_v18, %v2760_v6 }
0x1250   :  { %v4840_v34 = vpop.f32.mrb[56].mxu1  ;;  %5236 = vmatpush3.bf16.msra.mxu0 %v5235_v21 }
0x1251   :  { %2568 = vrot.lane.b32.xlu1 %v4840_v34, %s5437_s21  ;;  %v2522_v28 = vpop.f32.mrb[57].mxu1  ;;  %5237 = vmatprep.subr.bf16.mxu0 %v5432_v51  ;;  %v5259_v34 = vpack.c.bf16 %v2763_v27, %v2762_v26  ;;  %v5367_v26 = vld [vmem:[#allocation2 + $0x40] sm:$0xff]  ;;  %v5368_v27 = vld [vmem:[#allocation2 + $0x48] sm:$0xff] }
0x1252   :  { %2546 = vrot.lane.b32.xlu0 %v2502_v17, %s5435_s0 }
0x1254   :  { %v4843_v29 = vpop.f32.mrb[58].mxu1  ;;  %5239 = vmatpush3.bf16.msra.mxu0 %v5238_v2  ;;  %v2843_v2 = vld [vmem:[#allocation4 + $0x2f0] sm:$0xff] }
0x1255   :  { %2558 = vrot.lane.b32.xlu1 %v4837_v59, %s5436_s1  ;;  %v2532_v30 = vpop.f32.mrb[59].mxu1  ;;  %5240 = vmatprep.subr.bf16.mxu0 %v5432_v51 }
0x1256   :  { %2570 = vrot.lane.b32.xlu0 %v2532_v30, %s5437_s21 }
0x1258   :  { %5242 = vmatpush3.bf16.msra.mxu0 %v5241_v22  ;;  %v2846_v22 = vld [vmem:[#allocation4 + $0x308] sm:$0xff] }
0x1259   :  { %2548 = vrot.lane.b32.xlu1 %v4834_v62, %s5435_s0  ;;  %5243 = vmatprep.subr.bf16.mxu0 %v5432_v51 }
0x125a   :  { %2560 = vrot.lane.b32.xlu0 %v2522_v28, %s5436_s1  ;;  %v2844_v28 = vld [vmem:[#allocation4 + $0x2f8] sm:$0xff] }
0x125b   :  { %v5262_v8 = vpack.c.bf16 %v2844_v28, %v2843_v2  ;;  %v5370_v2 = vld [vmem:[#allocation2 + $0x58] sm:$0xff]  ;;  %v5371_v28 = vld [vmem:[#allocation2 + $0x60] sm:$0xff] }
0x125c   :  { %5245 = vmatpush3.bf16.msra.mxu0 %v5244_v33 }
0x125d   :  { %2572 = vrot.lane.b32.xlu1 %v4843_v29, %s5437_s21  ;;  %5246 = vmatprep.subr.bf16.mxu0 %v5432_v51 }
0x1260   :  { %5248 = vmatpush3.bf16.msra.mxu0 %v5247_v19  ;;  %v5360_v19 = vld [vmem:[#allocation2] sm:$0xff] }
0x1261   :  { %5249 = vmatprep.subr.bf16.mxu0 %v5432_v51 }
0x1264   :  { %5251 = vmatpush3.bf16.msra.mxu0 %v5250_v52 }
0x12b7   :  { %v2545_v53 = vpop.permute.xlu1 %2544 }
0x12b8   :  { %v2577_v56 = vsel %vm341_vm4, %v5809_v44, %v2545_v53 }
0x12c0   :  { %v2557_v54 = vpop.permute.xlu0 %2556 }
0x12c1   :  { %v2580_v47 = vsel %vm706_vm6, %v2577_v56, %v2557_v54  ;;  %v3081_v54 = vld [vmem:[#allocation4 + $0x468] sm:$0xff]  ;;  %v3082_v56 = vld [vmem:[#allocation4 + $0x470] sm:$0xff] }
0x12c3   :  { %v2569_v57 = vpop.permute.xlu1 %2568 }
0x12c4   :  { %v2583_v48 = vsel %vm710_vm7, %v2580_v47, %v2569_v57  ;;  %v2547_v58 = vpop.permute.xlu0 %2546  ;;  %v5271_v47 = vpack.c.bf16 %v3082_v56, %v3081_v54 }
0x12c5   :  { %4877 = vmatmul.mubr.f32.vlgmr.msra.gmra.mrb[28].mxu0 %v2583_v48  ;;  %v2578_v61 = vsel %vm341_vm4, %v5807_v42, %v2547_v58 }
0x12c6   :  { %4879 = vmatprep.mubr.msk.f32.mxu0 %vm5433_vm5, %v5434_v16 }
0x12c7   :  { %v2559_v63 = vpop.permute.xlu1 %2558 }
0x12c8   :  { %v2581_v3 = vsel %vm706_vm6, %v2578_v61, %v2559_v63  ;;  %v2571_v5 = vpop.permute.xlu0 %2570 }
0x12c9   :  { %v2584_v35 = vsel %vm710_vm7, %v2581_v3, %v2571_v5 }
0x12ca   :  { %4880 = vmatmul.mubr.f32.gmra.mrb[30].mxu0 %v2584_v35  ;;  %v5361_v35 = vld [vmem:[#allocation2 + $0x8] sm:$0xff] }
0x12cb   :  { %v2549_v36 = vpop.permute.xlu1 %2548  ;;  %4882 = vmatprep.mubr.msk.f32.mxu0 %vm5433_vm5, %v5434_v16 }
0x12cc   :  { %v2579_v37 = vsel %vm341_vm4, %v5812_v12, %v2549_v36  ;;  %v2561_v38 = vpop.permute.xlu0 %2560  ;;  %v3084_v36 = vld [vmem:[#allocation4 + $0x480] sm:$0xff] }
0x12cd   :  { %v2582_v39 = vsel %vm706_vm6, %v2579_v37, %v2561_v38 }
0x12cf   :  { %v2573_v40 = vpop.permute.xlu1 %2572 }
0x12d0   :  { %v2585_v41 = vsel %vm710_vm7, %v2582_v39, %v2573_v40 }
0x12d1   :  { %4883 = vmatmul.mubr.f32.gmra.mrb[32].mxu0 %v2585_v41 }
0x12d2   :  { %4918 = vmatprep.mubr.msk.f32.mxu0 %vm241_vm3, %v5631_v55 }
0x131a   :  { %v5852_v42 = vpop.f32.mrb[26].mxu0 }
0x131b   :  { %v5854_v43 = vpop.f32.mrb[27].mxu0  ;;  %v2926_v57 = vmul.f32 %v5852_v42, %v5639_v0  ;;  %v5362_v42 = vld [vmem:[#allocation2 + $0x10] sm:$0xff] }
0x131c   :  { %v2925_v48 = vmul.f32 %v5854_v43, %v5641_v1  ;;  %v3175_v43 = vld [vmem:[#allocation4 + $0x318] sm:$0xff] }
0x1398   :  { %v2673_v44 = vpop.f32.mrb[28].mxu0 }
0x1399   :  { %v4878_v45 = vpop.f32.mrb[29].mxu0  ;;  %v2674_v46 = vadd.f32 %v4186_v10, %v2673_v44  ;;  %v3176_v44 = vld [vmem:[#allocation4 + $0x320] sm:$0xff] }
0x139a   :  { %v3177_v45 = vld [vmem:[#allocation4 + $0x328] sm:$0xff] }
0x139b   :  { %v2687_v14 = vmax.f32 %v2674_v46, 0.0  ;;  %v3178_v46 = vld [vmem:[#allocation4 + $0x330] sm:$0xff] }
0x139d   :  { %v2678_v11 = vpop.f32.mrb[30].mxu0 }
0x139e   :  { %v2679_v12 = vadd.f32 %v4186_v10, %v2678_v11  ;;  %v4881_v13 = vpop.f32.mrb[31].mxu0  ;;  %v5283_v11 = vpack.c.bf16 %v3178_v46, %v3177_v45  ;;  %v3522_v46 = vld [vmem:[#allocation4 + $0x390] sm:$0xff] }
0x13a0   :  { %v2688_v62 = vmax.f32 %v2679_v12, 0.0 }
0x13a2   :  { %v5253_v15 = vpack.c.bf16 %v2688_v62, %v2687_v14 }
0x13a4   :  { %v2683_v17 = vpop.f32.mrb[32].mxu0  ;;  %5254 = vmatpush3.bf16.msra.mxu1 %v5253_v15 }
0x13a5   :  { %v2684_v59 = vadd.f32 %v4186_v10, %v2683_v17  ;;  %v4884_v55 = vpop.f32.mrb[33].mxu0  ;;  %4889 = vmatprep.subr.mxu1 %v5434_v16  ;;  %v5279_v10 = vpack.c.bf16 %v3176_v44, %v3175_v43  ;;  %v3521_v43 = vld [vmem:[#allocation4 + $0x388] sm:$0xff] }
0x13a6   :  { %v5364_v55 = vld [vmem:[#allocation2 + $0x28] sm:$0xff] }
0x13a7   :  { %v2689_v21 = vmax.f32 %v2684_v59, 0.0  ;;  %v5363_v59 = vld [vmem:[#allocation2 + $0x20] sm:$0xff] }
0x13a9   :  { %4890 = vmatpush3.msra.mxu1 %v2689_v21  ;;  %v5365_v21 = vld [vmem:[#allocation2 + $0x30] sm:$0xff] }
0x13aa   :  { %4892 = vmatmul.mubr.msk.f32.vlgmr.msra.gmra.mrb[60].mxu1 %vm818_vm8, %v5615_v20  ;;  %5255 = vmatprep.subr.bf16.mxu1 %v5432_v51  ;;  %v2845_v20 = vld [vmem:[#allocation4 + $0x300] sm:$0xff] }
0x13ab   :  { %5257 = vmatpush3.bf16.msra.mxu1 %v5256_v25  ;;  %4902 = vmatprep.mubr.msk.f32.mxu1 %vm5433_vm5, %v5434_v16  ;;  %v5265_v30 = vpack.c.bf16 %v2846_v22, %v2845_v20  ;;  %v5366_v25 = vld [vmem:[#allocation2 + $0x38] sm:$0xff]  ;;  %v4199_v20 = vld [vmem:[#allocation4 + $0x338] ss:$0 sm:$0xff] }
0x13ac   :  { %5258 = vmatprep.subr.bf16.mxu1 %v5432_v51 }
0x13af   :  { %5260 = vmatpush3.bf16.msra.mxu1 %v5259_v34  ;;  %v5369_v34 = vld [vmem:[#allocation2 + $0x50] sm:$0xff] }
0x13b0   :  { %5261 = vmatprep.subr.bf16.mxu1 %v5432_v51 }
0x147d   :  { %v2756_v23 = vpop.f32.mrb[60].mxu1 }
0x147e   :  { %v4893_v29 = vpop.f32.mrb[61].mxu1  ;;  %4903 = vmatmul.mubr.msk.f32.vlgmr.msra.gmra.mrb[62].mxu1 %vm341_vm4, %v2756_v23  ;;  %v5373_v23 = vld [vmem:[#allocation2 + $0x70] sm:$0xff] }
0x147f   :  { %5263 = vmatpush3.bf16.msra.mxu1 %v5262_v8  ;;  %4913 = vmatprep.mubr.msk.f32.mxu1 %vm5433_vm5, %v5434_v16  ;;  %v5372_v8 = vld [vmem:[#allocation2 + $0x68] sm:$0xff]  ;;  %v5374_v29 = vld [vmem:[#allocation2 + $0x78] sm:$0xff] }
0x1480   :  { %5264 = vmatprep.subr.bf16.mxu1 %v5432_v51 }
0x1483   :  { %5266 = vmatpush3.bf16.msra.mxu1 %v5265_v30 }
0x1551   :  { %v2838_v32 = vpop.f32.mrb[62].mxu1 }
0x1552   :  { %v2839_v33 = vadd.f32 %v4188_v31, %v2838_v32  ;;  %v4904_v9 = vpop.f32.mrb[63].mxu1 }
0x1554   :  { %v2842_v49 = vmax.f32 %v2839_v33, 0.0 }
0x1556   :  { %4914 = vmatmul.mubr.msk.f32.vlgmr.msra.gmra.mrb[64].mxu1 %vm341_vm4, %v2842_v49 }
0x1557   :  { %4925 = vmatprep.mubr.msk.f32.mxu1 %vm69_vm0, %v5360_v19 }
0x1629   :  { %v2921_v7 = vpop.f32.mrb[64].mxu1 }
0x162a   :  { %v2922_v52 = vadd.f32 %v4190_v50, %v2921_v7  ;;  %v4915_v53 = vpop.f32.mrb[65].mxu1  ;;  %v3512_v7 = vld [vmem:[#allocation4 + $0x340] sm:$0xff] }
0x162c   :  { %4916 = vmatprep.subr.mxu0 %v2922_v52 }
0x162d   :  { %4917 = vmatpush3.msra.mxu0 %v2922_v52  ;;  %v3513_v52 = vld [vmem:[#allocation4 + $0x348] sm:$0xff] }
0x162e   :  { %4919 = vmatmul.mubr.msk.f32.vlgmr.msra.gmra.mrb[34].mxu0 %vm241_vm3, %v5635_v60  ;;  %5272 = vmatprep.subr.bf16.mxu0 %v5271_v47  ;;  %v3083_v60 = vld [vmem:[#allocation4 + $0x478] sm:$0xff]  ;;  %v5296_v54 = vpack.c.bf16 %v3513_v52, %v3512_v7 }
0x162f   :  { %5274 = vmatpush3.bf16.msra.mxu0 %v5271_v47  ;;  %v5275_v37 = vpack.c.bf16 %v3084_v36, %v3083_v60  ;;  %v3514_v47 = vld [vmem:[#allocation4 + $0x350] sm:$0xff] }
0x1631   :  { %5276 = vmatprep.subr.bf16.mxu0 %v5275_v37 }
0x1633   :  { %5278 = vmatpush3.bf16.msra.mxu0 %v5275_v37  ;;  %v3518_v37 = vld [vmem:[#allocation4 + $0x370] sm:$0xff] }
0x1701   :  { %v4920_v58 = vpop.f32.mrb[34].mxu0 }
0x1702   :  { %v3003_v61 = vadd.f32 %v4920_v58, %v2926_v57  ;;  %v2993_v63 = vpop.f32.mrb[35].mxu0  ;;  %v3515_v57 = vld [vmem:[#allocation4 + $0x358] sm:$0xff] }
0x1703   :  { %v3002_v3 = vadd.f32 %v2993_v63, %v2925_v48  ;;  %v5375_v48 = vld [vmem:[#allocation2 + $0x18] sm:$0xff] }
0x1705   :  { %v5267_v5 = vpack.c.bf16 %v3003_v61, %v3002_v3  ;;  %v5299_v61 = vpack.c.bf16 %v3515_v57, %v3514_v47  ;;  %v3516_v3 = vld [vmem:[#allocation4 + $0x360] sm:$0xff] }
0x1707   :  { %5268 = vmatprep.subr.bf16.mxu1 %v5267_v5 }
0x1708   :  { %5270 = vmatpush3.bf16.msra.mxu1 %v5267_v5  ;;  %v3517_v5 = vld [vmem:[#allocation4 + $0x368] sm:$0xff] }
0x1709   :  { %5280 = vmatprep.subr.bf16.mxu1 %v5279_v10  ;;  %v5302_v60 = vpack.c.bf16 %v3517_v5, %v3516_v3 }
0x170b   :  { %4926 = vmatmul.mubr.msk.f32.vlgmr.msra.gmra.mrb[66].mxu1 %vm69_vm0, %v5361_v35 }
0x170c   :  { %5282 = vmatpush3.bf16.msra.mxu1 %v5279_v10 }
0x170d   :  { %5284 = vmatprep.subr.bf16.mxu1 %v5283_v11 }
0x1710   :  { %5286 = vmatpush3.bf16.msra.mxu1 %v5283_v11  ;;  %v3523_v11 = vld [vmem:[#allocation4 + $0x398] sm:$0xff] }
0x17de   :  { %v4927_v38 = vpop.f32.mrb[66].mxu1 }
0x17df   :  { %v3070_v39 = vpop.f32.mrb[67].mxu1  ;;  %v3080_v41 = vsub.f32 %v4927_v38, %v5772_v24  ;;  %v3519_v38 = vld [vmem:[#allocation4 + $0x378] sm:$0xff] }
0x17e0   :  { %v3079_v40 = vsub.f32 %v3070_v39, %v5770_v4  ;;  %v4196_v4 = vld [vmem:[#allocation4 + $0x488] ss:$0 sm:$0xff] }
0x17e2   :  { %4936 = vmatprep.mubr.msk.f32.mxu0 %vm341_vm4, %v3079_v40  ;;  %v5305_v40 = vpack.c.bf16 %v3519_v38, %v3518_v37  ;;  %v3769_v38 = vld [vmem:[#allocation4 + $0x3f0] sm:$0xff] }
0x17e3   :  { %4937 = vmatmul.mubr.msk.f32.vlgmr.msra.gmra.mrb[36].mxu0 %vm341_vm4, %v3080_v41 }
0x17e4   :  { %4954 = vmatprep.mubr.msk.f32.mxu0 %vm69_vm0, %v5362_v42  ;;  %v3520_v42 = vld [vmem:[#allocation4 + $0x380] sm:$0xff] }
0x17e5   :  { %v5308_v10 = vpack.c.bf16 %v3521_v43, %v3520_v42  ;;  %v3771_v43 = vld [vmem:[#allocation4 + $0x400] sm:$0xff] }
0x18b6   :  { %v4938_v12 = vpop.f32.mrb[36].mxu0 }
0x18b7   :  { %v3168_v24 = vadd.f32 %v4938_v12, %v4196_v4  ;;  %v3162_v13 = vpop.f32.mrb[37].mxu0  ;;  %v3524_v12 = vld [vmem:[#allocation4 + $0x3a0] sm:$0xff] }
0x18b8   :  { %v3163_v14 = vadd.f32 %v4196_v4, %v3162_v13  ;;  %v5311_v4 = vpack.c.bf16 %v3523_v11, %v3522_v46 }
0x18b9   :  { %v3172_v62 = vmax.f32 %v3168_v24, 0.0  ;;  %v3525_v24 = vld [vmem:[#allocation4 + $0x3a8] sm:$0xff] }
0x18ba   :  { %v3171_v15 = vmax.f32 %v3163_v14, 0.0  ;;  %v5314_v13 = vpack.c.bf16 %v3525_v24, %v3524_v12  ;;  %v3526_v14 = vld [vmem:[#allocation4 + $0x3b0] sm:$0xff] }
0x18bb   :  { %v3174_v17 = vmul.f32 2.0, %v3172_v62  ;;  %v3527_v62 = vld [vmem:[#allocation4 + $0x3b8] sm:$0xff]  ;;  %v3930_v24 = vld [vmem:[#allocation4 + $0x490] sm:$0xff] }
0x18bc   :  { %v3173_v6 = vmul.f32 2.0, %v3171_v15  ;;  %v5317_v15 = vpack.c.bf16 %v3527_v62, %v3526_v14  ;;  %v4220_v62 = vld [vmem:[#allocation4 + $0x410] ss:$0 sm:$0xff] }
0x18be   :  { %v5291_v18 = vpack.c.bf16 %v3174_v17, %v3173_v6  ;;  %4947 = vmatprep.mubr.msk.f32.mxu1 %vm341_vm4, %v3173_v6 }
0x18bf   :  { %4948 = vmatmul.mubr.msk.f32.vlgmr.msra.gmra.mrb[68].mxu1 %vm341_vm4, %v3174_v17 }
0x18c0   :  { %5292 = vmatprep.subr.bf16.mxu1 %v5291_v18  ;;  %4961 = vmatprep.mubr.msk.f32.mxu1 %vm69_vm0, %v5363_v59 }
0x18c1   :  { %5294 = vmatpush3.bf16.msra.mxu1 %v5291_v18 }
0x18c2   :  { %5319 = vmatprep.subr.bf16.mxu1 %v5432_v51 }
0x18c4   :  { %4962 = vmatmul.mubr.msk.f32.vlgmr.msra.gmra.mrb[70].mxu1 %vm69_vm0, %v5364_v55 }
0x18c5   :  { %4964 = vmatprep.mubr.msk.f32.mxu1 %vm69_vm0, %v5365_v21 }
0x18c8   :  { %4965 = vmatmul.mubr.msk.f32.gmra.mrb[72].mxu1 %vm69_vm0, %v5366_v25 }
0x18c9   :  { %4967 = vmatprep.mubr.msk.f32.mxu1 %vm69_vm0, %v5367_v26 }
0x18cc   :  { %4968 = vmatmul.mubr.msk.f32.gmra.mrb[74].mxu1 %vm69_vm0, %v5368_v27 }
0x18cd   :  { %4970 = vmatprep.mubr.msk.f32.mxu1 %vm69_vm0, %v5369_v34 }
0x18d0   :  { %4971 = vmatmul.mubr.msk.f32.gmra.mrb[76].mxu1 %vm69_vm0, %v5370_v2 }
0x18d1   :  { %4973 = vmatprep.mubr.msk.f32.mxu1 %vm69_vm0, %v5371_v28 }
0x18d4   :  { %4974 = vmatmul.mubr.msk.f32.gmra.mrb[78].mxu1 %vm69_vm0, %v5372_v8 }
0x18d5   :  { %4976 = vmatprep.mubr.msk.f32.mxu1 %vm69_vm0, %v5373_v23 }
0x18d8   :  { %4977 = vmatmul.mubr.msk.f32.gmra.mrb[80].mxu1 %vm69_vm0, %v5374_v29 }
0x18d9   :  { %5026 = vmatprep.mubr.msk.f32.mxu1 %vm5433_vm5, %v5434_v16 }
0x1992   :  { %v4949_v22 = vpop.f32.mrb[68].mxu1 }
0x1993   :  { %v3262_v30 = vadd.f32 %v4949_v22, %v4199_v20  ;;  %v3256_v31 = vpop.f32.mrb[69].mxu1 }
0x1994   :  { %v3257_v32 = vadd.f32 %v4199_v20, %v3256_v31  ;;  %v5376_v31 = vld [vmem:[#allocation2 + $0x80] sm:$0xff] }
0x1995   :  { %v3266_v33 = vmax.f32 %v3262_v30, 0.0 }
0x1996   :  { %v3265_v9 = vmax.f32 %v3257_v32, 0.0 }
0x1997   :  { %v5899_v49 = vpop.f32.mrb[70].mxu1 }
0x1998   :  { %v5287_v19 = vpack.c.bf16 %v3266_v33, %v3265_v9  ;;  %v5901_v50 = vpop.f32.mrb[71].mxu1 }
0x199a   :  { %5288 = vmatprep.subr.bf16.mxu0 %v5287_v19 }
0x199b   :  { %5290 = vmatpush3.bf16.msra.mxu0 %v5287_v19  ;;  %v4966_v53 = vpop.f32.mrb[72].mxu1 }
0x199c   :  { %3470 = vrot.lane.b32.xlu0 %v4966_v53, %s5435_s0  ;;  %v5904_v56 = vpop.f32.mrb[73].mxu1  ;;  %5295 = vmatprep.subr.bf16.mxu0 %v5432_v51 }
0x199e   :  { %4955 = vmatmul.mubr.msk.f32.vlgmr.msra.gmra.mrb[38].mxu0 %vm69_vm0, %v5375_v48  ;;  %v3686_v48 = vld [vmem:[#allocation4 + $0x3c8] sm:$0xff] }
0x199f   :  { %v4969_v58 = vpop.f32.mrb[74].mxu1  ;;  %5297 = vmatpush3.bf16.msra.mxu0 %v5296_v54  ;;  %5011 = vmatprep.mubr.msk.f32.mxu0 %vm5433_vm5, %v5434_v16 }
0x19a0   :  { %v3428_v63 = vpop.f32.mrb[75].mxu1  ;;  %5298 = vmatprep.subr.bf16.mxu0 %v5432_v51 }
0x19a3   :  { %v4972_v35 = vpop.f32.mrb[76].mxu1  ;;  %5300 = vmatpush3.bf16.msra.mxu0 %v5299_v61 }
0x19a4   :  { %v3438_v36 = vpop.f32.mrb[77].mxu1  ;;  %5301 = vmatprep.subr.bf16.mxu0 %v5432_v51 }
0x19a5   :  { %3482 = vrot.lane.b32.xlu1 %v3438_v36, %s5436_s1  ;;  %v5377_v36 = vld [vmem:[#allocation2 + $0xa8] sm:$0xff] }
0x19a7   :  { %v4975_v39 = vpop.f32.mrb[78].mxu1  ;;  %5303 = vmatpush3.bf16.msra.mxu0 %v5302_v60  ;;  %v3689_v60 = vld [vmem:[#allocation4 + $0x3e0] sm:$0xff] }
0x19a8   :  { %3494 = vrot.lane.b32.xlu0 %v4975_v39, %s5437_s21  ;;  %v3448_v41 = vpop.f32.mrb[79].mxu1  ;;  %5304 = vmatprep.subr.bf16.mxu0 %v5432_v51  ;;  %v3770_v39 = vld [vmem:[#allocation4 + $0x3f8] sm:$0xff] }
0x19a9   :  { %3472 = vrot.lane.b32.xlu1 %v3428_v63, %s5435_s0 }
0x19ab   :  { %v4978_v44 = vpop.f32.mrb[80].mxu1  ;;  %5306 = vmatpush3.bf16.msra.mxu0 %v5305_v40  ;;  %v5329_v40 = vpack.c.bf16 %v3770_v39, %v3769_v38 }
0x19ac   :  { %3484 = vrot.lane.b32.xlu0 %v4972_v35, %s5436_s1  ;;  %v3458_v45 = vpop.f32.mrb[81].mxu1  ;;  %5307 = vmatprep.subr.bf16.mxu0 %v5432_v51  ;;  %v3688_v35 = vld [vmem:[#allocation4 + $0x3d8] sm:$0xff] }
0x19ad   :  { %3496 = vrot.lane.b32.xlu1 %v3458_v45, %s5437_s21  ;;  %v5326_v37 = vpack.c.bf16 %v3689_v60, %v3688_v35  ;;  %v4218_v45 = vld [vmem:[#allocation4 + $0x3e8] ss:$0 sm:$0xff] }
0x19af   :  { %5309 = vmatpush3.bf16.msra.mxu0 %v5308_v10 }
0x19b0   :  { %3474 = vrot.lane.b32.xlu0 %v4969_v58, %s5435_s0  ;;  %5310 = vmatprep.subr.bf16.mxu0 %v5432_v51  ;;  %v3687_v58 = vld [vmem:[#allocation4 + $0x3d0] sm:$0xff] }
0x19b1   :  { %3486 = vrot.lane.b32.xlu1 %v3448_v41, %s5436_s1  ;;  %v5323_v5 = vpack.c.bf16 %v3687_v58, %v3686_v48 }
0x19b3   :  { %5312 = vmatpush3.bf16.msra.mxu0 %v5311_v4 }
0x19b4   :  { %3498 = vrot.lane.b32.xlu0 %v4978_v44, %s5437_s21  ;;  %5313 = vmatprep.subr.bf16.mxu0 %v5432_v51  ;;  %v3772_v44 = vld [vmem:[#allocation4 + $0x408] sm:$0xff] }
0x19b5   :  { %v5332_v10 = vpack.c.bf16 %v3772_v44, %v3771_v43 }
0x19b7   :  { %5315 = vmatpush3.bf16.msra.mxu0 %v5314_v13  ;;  %v3931_v13 = vld [vmem:[#allocation4 + $0x498] sm:$0xff] }
0x19b8   :  { %5316 = vmatprep.subr.bf16.mxu0 %v5432_v51  ;;  %v5334_v14 = vpack.c.bf16 %v3931_v13, %v3930_v24 }
0x19bb   :  { %5318 = vmatpush3.bf16.msra.mxu0 %v5317_v15 }
0x1a0e   :  { %v3471_v17 = vpop.permute.xlu0 %3470 }
0x1a0f   :  { %v3503_v18 = vsel %vm341_vm4, %v5901_v50, %v3471_v17 }
0x1a17   :  { %v3483_v6 = vpop.permute.xlu1 %3482 }
0x1a18   :  { %v3506_v59 = vsel %vm706_vm6, %v3503_v18, %v3483_v6  ;;  %v5378_v18 = vld [vmem:[#allocation2 + $0x88] sm:$0xff] }
0x1a1a   :  { %v3495_v55 = vpop.permute.xlu0 %3494 }
0x1a1b   :  { %v3509_v21 = vsel %vm710_vm7, %v3506_v59, %v3495_v55  ;;  %v3473_v25 = vpop.permute.xlu1 %3472  ;;  %v3932_v59 = vld [vmem:[#allocation4 + $0x4a0] sm:$0xff]  ;;  %v3933_v55 = vld [vmem:[#allocation4 + $0x4a8] sm:$0xff] }
0x1a1c   :  { %5012 = vmatmul.mubr.f32.vlgmr.msra.gmra.mrb[40].mxu0 %v3509_v21  ;;  %v3504_v26 = vsel %vm341_vm4, %v5899_v49, %v3473_v25  ;;  %v4216_v49 = vld [vmem:[#allocation4 + $0x3c0] ss:$0 sm:$0xff]  ;;  %v5338_v21 = vpack.c.bf16 %v3933_v55, %v3932_v59 }
0x1a1d   :  { %5014 = vmatprep.mubr.msk.f32.mxu0 %vm5433_vm5, %v5434_v16 }
0x1a1e   :  { %v3485_v27 = vpop.permute.xlu0 %3484 }
0x1a1f   :  { %v3507_v34 = vsel %vm706_vm6, %v3504_v26, %v3485_v27  ;;  %v3497_v2 = vpop.permute.xlu1 %3496 }
0x1a20   :  { %v3510_v28 = vsel %vm710_vm7, %v3507_v34, %v3497_v2 }
0x1a21   :  { %5015 = vmatmul.mubr.f32.gmra.mrb[42].mxu0 %v3510_v28 }
0x1a22   :  { %v3475_v8 = vpop.permute.xlu0 %3474  ;;  %5017 = vmatprep.mubr.msk.f32.mxu0 %vm5433_vm5, %v5434_v16 }
0x1a23   :  { %v3505_v23 = vsel %vm341_vm4, %v5904_v56, %v3475_v8  ;;  %v3487_v29 = vpop.permute.xlu1 %3486 }
0x1a24   :  { %v3508_v20 = vsel %vm706_vm6, %v3505_v23, %v3487_v29  ;;  %v65_v23 = vld [vmem:[#allocation2 + $0xa0] sm:$0xff] }
0x1a25   :  { %v4226_v29 = vld [vmem:[#allocation4 + $0x4b0] ss:$0 sm:$0xff] }
0x1a26   :  { %v3499_v22 = vpop.permute.xlu0 %3498 }
0x1a27   :  { %v3511_v30 = vsel %vm710_vm7, %v3508_v20, %v3499_v22 }
0x1a28   :  { %5018 = vmatmul.mubr.f32.gmra.mrb[44].mxu0 %v3511_v30 }
0x1a29   :  { %5053 = vmatprep.mubr.msk.f32.mxu0 %vm241_vm3, %v5376_v31 }
0x1a71   :  { %v5942_v32 = vpop.f32.mrb[38].mxu0 }
0x1a72   :  { %v5944_v33 = vpop.f32.mrb[39].mxu0  ;;  %v3852_v25 = vmul.f32 %v5942_v32, %v5639_v0 }
0x1a73   :  { %v3851_v26 = vmul.f32 %v5944_v33, %v5641_v1 }
0x1aef   :  { %v3599_v9 = vpop.f32.mrb[40].mxu0 }
0x1af0   :  { %v5013_v19 = vpop.f32.mrb[41].mxu0  ;;  %v3600_v50 = vadd.f32 %v4216_v49, %v3599_v9 }
0x1af2   :  { %v3613_v54 = vmax.f32 %v3600_v50, 0.0 }
0x1af4   :  { %v3604_v7 = vpop.f32.mrb[42].mxu0 }
0x1af5   :  { %v3605_v52 = vadd.f32 %v4216_v49, %v3604_v7  ;;  %v5016_v53 = vpop.f32.mrb[43].mxu0 }
0x1af7   :  { %v3614_v56 = vmax.f32 %v3605_v52, 0.0 }
0x1af9   :  { %v5320_v47 = vpack.c.bf16 %v3614_v56, %v3613_v54 }
0x1afb   :  { %v3609_v57 = vpop.f32.mrb[44].mxu0  ;;  %5321 = vmatpush3.bf16.msra.mxu1 %v5320_v47 }
0x1afc   :  { %v3610_v61 = vadd.f32 %v4216_v49, %v3609_v57  ;;  %v5019_v63 = vpop.f32.mrb[45].mxu0  ;;  %5024 = vmatprep.subr.mxu1 %v5434_v16 }
0x1afe   :  { %v3615_v3 = vmax.f32 %v3610_v61, 0.0 }
0x1b00   :  { %5025 = vmatpush3.msra.mxu1 %v3615_v3 }
0x1b01   :  { %5027 = vmatmul.mubr.msk.f32.vlgmr.msra.gmra.mrb[82].mxu1 %vm818_vm8, %v5377_v36  ;;  %5322 = vmatprep.subr.bf16.mxu1 %v5432_v51 }
0x1b02   :  { %5324 = vmatpush3.bf16.msra.mxu1 %v5323_v5  ;;  %5037 = vmatprep.mubr.msk.f32.mxu1 %vm5433_vm5, %v5434_v16 }
0x1b03   :  { %5325 = vmatprep.subr.bf16.mxu1 %v5432_v51 }
0x1b06   :  { %5327 = vmatpush3.bf16.msra.mxu1 %v5326_v37 }
0x1b07   :  { %5328 = vmatprep.subr.bf16.mxu1 %v5432_v51 }
0x1bd4   :  { %v3682_v41 = vpop.f32.mrb[82].mxu1 }
0x1bd5   :  { %5038 = vmatmul.mubr.msk.f32.vlgmr.msra.gmra.mrb[84].mxu1 %vm341_vm4, %v3682_v41  ;;  %v5028_v42 = vpop.f32.mrb[83].mxu1 }
0x1bd6   :  { %5330 = vmatpush3.bf16.msra.mxu1 %v5329_v40  ;;  %5048 = vmatprep.mubr.msk.f32.mxu1 %vm5433_vm5, %v5434_v16 }
0x1bd7   :  { %5331 = vmatprep.subr.bf16.mxu1 %v5432_v51 }
0x1bda   :  { %5333 = vmatpush3.bf16.msra.mxu1 %v5332_v10 }
0x1bdb   :  { %5335 = vmatprep.subr.bf16.mxu1 %v5334_v14 }
0x1ca8   :  { %v3764_v46 = vpop.f32.mrb[84].mxu1 }
0x1ca9   :  { %v3765_v11 = vadd.f32 %v4218_v45, %v3764_v46  ;;  %v5039_v4 = vpop.f32.mrb[85].mxu1 }
0x1cab   :  { %v3768_v12 = vmax.f32 %v3765_v11, 0.0 }
0x1cad   :  { %5049 = vmatmul.mubr.msk.f32.vlgmr.msra.gmra.mrb[86].mxu1 %vm341_vm4, %v3768_v12 }
0x1cae   :  { %5337 = vmatpush3.bf16.msra.mxu1 %v5334_v14 }
0x1caf   :  { %5339 = vmatprep.subr.bf16.mxu1 %v5338_v21 }
0x1cb2   :  { %5341 = vmatpush3.bf16.msra.mxu1 %v5338_v21 }
0x1d80   :  { %v3847_v15 = vpop.f32.mrb[86].mxu1 }
0x1d81   :  { %v3848_v17 = vadd.f32 %v4220_v62, %v3847_v15  ;;  %v5050_v6 = vpop.f32.mrb[87].mxu1 }
0x1d83   :  { %5051 = vmatprep.subr.mxu0 %v3848_v17 }
0x1d84   :  { %5052 = vmatpush3.msra.mxu0 %v3848_v17 }
0x1d85   :  { %5054 = vmatmul.mubr.msk.f32.vlgmr.msra.gmra.mrb[46].mxu0 %vm241_vm3, %v5378_v18  ;;  %5342 = vmatprep.subr.bf16.mxu0 %v5432_v51 }
0x1d86   :  { %5071 = vmatprep.mubr.msk.f32.mxu0 %vm5433_vm5, %v5434_v16 }
0x1e58   :  { %v5055_v27 = vpop.f32.mrb[46].mxu0 }
0x1e59   :  { %v3929_v34 = vadd.f32 %v5055_v27, %v3852_v25  ;;  %v3919_v2 = vpop.f32.mrb[47].mxu0 }
0x1e5a   :  { %v3928_v28 = vadd.f32 %v3919_v2, %v3851_v26 }
0x1e5c   :  { %5064 = vmatprep.mubr.msk.f32.mxu1 %vm341_vm4, %v3928_v28 }
0x1e5d   :  { %5065 = vmatmul.mubr.msk.f32.vlgmr.msra.gmra.mrb[88].mxu1 %vm341_vm4, %v3929_v34 }
0x1f30   :  { %v5066_v51 = vpop.f32.mrb[88].mxu1 }
0x1f31   :  { %v4006_v16 = vpop.f32.mrb[89].mxu1 }
0x1f32   :  { %v5343_v8 = vpack.c.bf16 %v5066_v51, %v4006_v16 }
0x1f34   :  { %5344 = vmatpush3.bf16.msra.mxu0 %v5343_v8 }
0x1f37   :  { %5072 = vmatmul.mubr.msk.f32.vlgmr.msra.gmra.mrb[48].mxu0 %vm69_vm0, %v65_v23 }
0x200a   :  { %v4089_v0 = vpop.f32.mrb[48].mxu0 }
0x200b   :  { %v4090_v20 = vadd.f32 %v4226_v29, %v4089_v0  ;;  %v5073_v1 = vpop.f32.mrb[49].mxu0 }
0x200d   :  { %4094 = vst.msk [vmem:[%s5976_s4] sm:$0xff] %vm4093_vm9, %v4090_v20 }
0x200e   :  { %4099 = vsyncpa [#allocation3], 1 }
0x200f   :  { %4100 = vsyncpa [#allocation5], 1 }

</bundles_post_ra>
